<compile_context>
chip_gen: v7x
topology: tpu7x:2x2x1
jax: 0.10.0
libtpu: 0.0.40
codegen_flags: <defaults>
</compile_context>

<pallas_src>
import jax
import jax.numpy as jnp
from jax.experimental import pallas as pl
from jax.experimental.pallas import tpu as pltpu


def _round_up(x, m):
    return (x + m - 1) // m * m


def _get_vmem_limit():
    # ~3/4 of physical VMEM, clamped to [32 MiB, 96 MiB] (v7x: 64 MiB phys -> 48 MiB).
    try:
        cap = int(pltpu.get_tpu_info().vmem_capacity_bytes)
    except Exception:
        cap = 64 * 1024 * 1024
    return max(32 * 1024 * 1024, min(96 * 1024 * 1024, (cap * 3) // 4))


_VMEM_LIMIT = _get_vmem_limit()


def _choose_row_tile(m, pref=512):
    """Row tile (multiple of 8) and padded row count; prefer >= 2 blocks."""
    mp = _round_up(m, 8)
    if mp <= pref:
        if mp >= 16 and mp % 16 == 0:
            return mp // 2, mp          # split so both TensorCores get work
        return mp, mp
    mp = _round_up(m, pref)
    return pref, mp


def _choose_flat_tile(mp):
    """Largest power-of-two-ish divisor of mp giving >= 2 blocks."""
    for t in (1024, 512, 256, 128, 64, 32, 16, 8):
        if t < mp and mp % t == 0:
            return t
    return mp


# ----------------------------------------------------------------------------
# Conv2d (+bias, +ReLU, optional fused BN statistics) as tiled im2col GEMM
# ----------------------------------------------------------------------------
def _gemm_bias_act_kernel_factory(relu):
    def kernel(x_ref, w_ref, b_ref, o_ref):
        acc = jnp.dot(x_ref[...], w_ref[...], preferred_element_type=jnp.float32)
        acc = acc + b_ref[...]                         # (1, TN) broadcast
        if relu:
            acc = jnp.maximum(acc, 0.0)
        o_ref[...] = acc.astype(o_ref.dtype)
    return kernel


def _gemm_bias_act_stats_kernel_factory(relu):
    def kernel(x_ref, w_ref, b_ref, o_ref, s_ref):
        # s_ref is a resident (2, TN) accumulator across the (inner) M axis.
        @pl.when(pl.program_id(1) == 0)
        def _():
            s_ref[...] = jnp.zeros_like(s_ref)
        acc = jnp.dot(x_ref[...], w_ref[...], preferred_element_type=jnp.float32)
        acc = acc + b_ref[...]
        s = jnp.sum(acc, axis=0, keepdims=True)        # per-channel sum
        ss = jnp.sum(acc * acc, axis=0, keepdims=True)  # per-channel sum of squares
        s_ref[...] += jnp.concatenate([s, ss], axis=0)
        if relu:
            acc = jnp.maximum(acc, 0.0)
        o_ref[...] = acc.astype(o_ref.dtype)
    return kernel


def conv2d(x, w, b=None, *, padding=0, relu=False, with_stats=False,
           out_dtype=jnp.bfloat16):
    """x: (N,H,W,Cin), w: (KH,KW,Cin,Cout) HWIO, b: (Cout,) or None.

    with_stats=True (requires b is None): additionally returns per-channel
    (sum, sum_sq) accumulated in the GEMM epilogue, plus the flat padded
    (Mp, Coutp) output so the following BN apply stays lane-dense.
    """
    N, H, W, Cin = x.shape
    KH, KW, _, Cout = w.shape
    Hp, Wp = H + 2 * padding, W + 2 * padding
    Ho, Wo = Hp - KH + 1, Wp - KW + 1
    K = KH * KW * Cin
    M = N * Ho * Wo

    # bf16 cast BEFORE the KH*KW-view expansion (halves expanded HBM traffic).
    xp = jnp.pad(x, ((0, 0), (padding, padding), (padding, padding), (0, 0)))
    xp = xp.astype(jnp.bfloat16)
    patches = jnp.concatenate(
        [xp[:, kh:kh + Ho, kw:kw + Wo, :] for kh in range(KH) for kw in range(KW)],
        axis=-1).reshape(M, K)

    Kp = _round_up(K, 128)            # aligned MXU lanes (zero-padded K rows)
    Coutp = _round_up(Cout, 128)      # lane-dense output stores
    TM, Mp = _choose_row_tile(M)
    TN = 128                          # good on v5e's 4x128 MXU; fine on v6e/v7x
    patches = jnp.pad(patches, ((0, Mp - M), (0, Kp - K)))
    wf = jnp.pad(w.reshape(K, Cout), ((0, Kp - K), (0, Coutp - Cout)))
    wf = wf.astype(jnp.bfloat16)
    bias = b if b is not None else jnp.zeros((Cout,), jnp.float32)
    bias = jnp.pad(bias.astype(jnp.float32), (0, Coutp - Cout)).reshape(1, Coutp)

    # Grid ordered (Cout tile, M tile): the weight block only changes with j,
    # so it is effectively resident across each full M sweep.
    grid = (Coutp // TN, Mp // TM)
    in_specs = [
        pl.BlockSpec((TM, Kp), lambda j, i: (i, 0)),
        pl.BlockSpec((Kp, TN), lambda j, i: (0, j)),
        pl.BlockSpec((1, TN), lambda j, i: (0, j)),
    ]
    if with_stats:
        assert b is None  # padded rows must contribute 0 to the statistics
        out_shape = (jax.ShapeDtypeStruct((Mp, Coutp), out_dtype),
                     jax.ShapeDtypeStruct((2, Coutp), jnp.float32))
        out_specs = (pl.BlockSpec((TM, TN), lambda j, i: (i, j)),
                     pl.BlockSpec((2, TN), lambda j, i: (0, j)))
        dims = ("parallel", "arbitrary")   # M axis is the stats reduction axis
        kernel = _gemm_bias_act_stats_kernel_factory(relu)
    else:
        out_shape = jax.ShapeDtypeStruct((Mp, Coutp), out_dtype)
        out_specs = pl.BlockSpec((TM, TN), lambda j, i: (i, j))
        dims = ("parallel", "parallel")
        kernel = _gemm_bias_act_kernel_factory(relu)

    out = pl.pallas_call(
        kernel, out_shape=out_shape, grid=grid,
        in_specs=in_specs, out_specs=out_specs,
        compiler_params=pltpu.CompilerParams(
            dimension_semantics=dims, vmem_limit_bytes=_VMEM_LIMIT),
    )(patches, wf, bias)

    if with_stats:
        y_flat, stats = out
        return y_flat, stats, (N, Ho, Wo, M, Cout)
    return out[:M, :Cout].reshape(N, Ho, Wo, Cout)


# ----------------------------------------------------------------------------
# MaxPool2d (kernel == stride, PyTorch floor mode) — large lane-friendly blocks
# ----------------------------------------------------------------------------
def _maxpool_kernel_factory(kh, kw, C):
    def kernel(x_ref, o_ref):
        v = x_ref[...]                        # (TR, kh, Wo, kw*C)
        m = jnp.max(v, axis=1)                # reduce kh over a leading axis (cheap)
        if kw == 1:
            o_ref[...] = m
        else:
            r = m[..., 0:C]
            for j in range(1, kw):            # kw window lives on the lane axis
                r = jnp.maximum(r, m[..., j * C:(j + 1) * C])
            o_ref[...] = r
    return kernel


def _choose_pool_rows(R, row_bytes, budget=4 << 20):
    cap = max(1, budget // max(1, row_bytes))
    cap = min(cap, R)
    if R >= 2:
        cap = min(cap, max(1, R // 2))        # keep >= 2 parallel blocks
    for t in range(cap, 0, -1):
        if R % t == 0:
            return t
    return 1


def maxpool2d(x, kh, kw):
    N, H, W, C = x.shape
    Ho, Wo = H // kh, W // kw
    x = x[:, :Ho * kh, :Wo * kw, :]           # floor-mode crop (PyTorch default)
    R = N * Ho
    xr = x.reshape(R, kh, Wo, kw * C)         # free row-major reshape
    row_bytes = kh * Wo * kw * C * x.dtype.itemsize
    TR = _choose_pool_rows(R, row_bytes)

    out = pl.pallas_call(
        _maxpool_kernel_factory(kh, kw, C),
        out_shape=jax.ShapeDtypeStruct((R, Wo, C), x.dtype),
        grid=(R // TR,),
        in_specs=[pl.BlockSpec((TR, kh, Wo, kw * C), lambda r: (r, 0, 0, 0))],
        out_specs=pl.BlockSpec((TR, Wo, C), lambda r: (r, 0, 0)),
        compiler_params=pltpu.CompilerParams(
            dimension_semantics=("parallel",), vmem_limit_bytes=_VMEM_LIMIT),
    )(xr)
    return out.reshape(N, Ho, Wo, C)


# ----------------------------------------------------------------------------
# BatchNorm2d apply (+ReLU) on the padded flat conv output (stats come fused
# from the conv epilogue — train-mode batch statistics)
# ----------------------------------------------------------------------------
def _bn_apply_kernel_factory(inv_count, eps):
    def kernel(x_ref, s_ref, g_ref, b_ref, o_ref):
        mean = s_ref[0:1, :] * inv_count
        var = jnp.maximum(s_ref[1:2, :] * inv_count - mean * mean, 0.0)
        scale = g_ref[...] * jax.lax.rsqrt(var + eps)
        shift = b_ref[...] - mean * scale
        xv = x_ref[...].astype(jnp.float32)
        o_ref[...] = jnp.maximum(xv * scale + shift, 0.0).astype(o_ref.dtype)
    return kernel


def batchnorm_relu_flat(x_flat, stats, gamma, beta, *, count, eps=1e-5):
    Mp, Cp = x_flat.shape
    C = gamma.shape[0]
    g = jnp.pad(gamma.astype(jnp.float32), (0, Cp - C)).reshape(1, Cp)
    bt = jnp.pad(beta.astype(jnp.float32), (0, Cp - C)).reshape(1, Cp)
    TM = _choose_flat_tile(Mp)

    # TODO(synk): running_mean/var buffer updates (training side-effect) are not materialized.
    return pl.pallas_call(
        _bn_apply_kernel_factory(1.0 / float(count), eps),
        out_shape=jax.ShapeDtypeStruct((Mp, Cp), x_flat.dtype),
        grid=(Mp // TM,),
        in_specs=[pl.BlockSpec((TM, Cp), lambda i: (i, 0)),
                  pl.BlockSpec((2, Cp), lambda i: (0, 0)),
                  pl.BlockSpec((1, Cp), lambda i: (0, 0)),
                  pl.BlockSpec((1, Cp), lambda i: (0, 0))],
        out_specs=pl.BlockSpec((TM, Cp), lambda i: (i, 0)),
        compiler_params=pltpu.CompilerParams(
            dimension_semantics=("parallel",), vmem_limit_bytes=_VMEM_LIMIT),
    )(x_flat, stats, g, bt)


def conv_bn_relu(x, w, gamma, beta, *, padding=1, eps=1e-5):
    """Conv (no bias) with BN statistics fused into the GEMM epilogue, then
    BN-apply + ReLU on the lane-dense padded GEMM output."""
    y_flat, stats, (N, Ho, Wo, M, C) = conv2d(
        x, w, None, padding=padding, relu=False, with_stats=True)
    y_flat = batchnorm_relu_flat(y_flat, stats, gamma, beta, count=M, eps=eps)
    return y_flat[:M, :C].reshape(N, Ho, Wo, C)


# ----------------------------------------------------------------------------
# Parameters (deterministic synthetic init) and forward pass
# ----------------------------------------------------------------------------
def init_params(key, in_ch, out_ch):
    c8, c4, c2 = out_ch // 8, out_ch // 4, out_ch // 2
    cfgs = [  # (cin, cout, k, has_bias)
        (in_ch, c8, 3, True),
        (c8, c4, 3, True),
        (c4, c2, 3, True),
        (c2, c2, 3, True),
        (c2, out_ch, 3, False),
        (out_ch, out_ch, 3, False),
        (out_ch, out_ch, 2, True),
    ]
    params = {}
    keys = jax.random.split(key, 2 * len(cfgs))
    for i, (cin, cout, k, bias) in enumerate(cfgs):
        bound = 1.0 / float((cin * k * k) ** 0.5)
        params[f"w{i}"] = jax.random.uniform(
            keys[2 * i], (k, k, cin, cout), jnp.float32, -bound, bound)
        if bias:
            params[f"b{i}"] = jax.random.uniform(
                keys[2 * i + 1], (cout,), jnp.float32, -bound, bound)
    for j in range(2):
        params[f"bn{j}_g"] = jnp.ones((out_ch,), jnp.float32)
        params[f"bn{j}_b"] = jnp.zeros((out_ch,), jnp.float32)
    return params


def vgg_forward(x_nchw, params):
    # Inter-layer activations are carried in bfloat16 (GEMM / BN stats in fp32).
    x = jnp.transpose(x_nchw, (0, 2, 3, 1))                     # NCHW -> NHWC
    x = conv2d(x, params["w0"], params["b0"], padding=1, relu=True)
    x = maxpool2d(x, 2, 2)
    x = conv2d(x, params["w1"], params["b1"], padding=1, relu=True)
    x = maxpool2d(x, 2, 2)
    x = conv2d(x, params["w2"], params["b2"], padding=1, relu=True)
    x = conv2d(x, params["w3"], params["b3"], padding=1, relu=True)
    x = maxpool2d(x, 2, 1)                                      # MaxPool2d((2,1),(2,1))
    x = conv_bn_relu(x, params["w4"], params["bn0_g"], params["bn0_b"], padding=1)
    x = conv_bn_relu(x, params["w5"], params["bn1_g"], params["bn1_b"], padding=1)
    x = maxpool2d(x, 2, 1)
    x = conv2d(x, params["w6"], params["b6"], padding=0, relu=True,
               out_dtype=jnp.float32)
    return jnp.transpose(x, (0, 3, 1, 2))                       # NHWC -> NCHW


if __name__ == "__main__":
    key = jax.random.PRNGKey(0)
    kx, kp = jax.random.split(key)
    in_channels, out_channels = 4, 32            # small synthetic config (512 -> 32)
    x = jax.random.normal(kx, (2, in_channels, 32, 16), jnp.float32)
    params = init_params(kp, in_channels, out_channels)

    y = jax.jit(vgg_forward)(x, params)
    jax.block_until_ready(y)
    assert y.shape == (2, out_channels, 1, 3), y.shape
    assert bool(jnp.all(jnp.isfinite(y)))
    print("KERNEL_OK")
</pallas_src>

<mosaic_0001>
module attributes {stable_mosaic.version = 11 : i64} {
  func.func @kernel(%arg0: i32, %arg1: i32, %arg2: memref<512x128xbf16, #tpu.memory_space<vmem>>, %arg3: memref<128x128xbf16, #tpu.memory_space<vmem>>, %arg4: memref<1x128xf32, #tpu.memory_space<vmem>>, %arg5: memref<512x128xbf16, #tpu.memory_space<vmem>>) attributes {dimension_semantics = [#tpu.dimension_semantics<parallel>, #tpu.dimension_semantics<parallel>], iteration_bounds = array<i64: 1, 2>, scalar_prefetch = 0 : i64, scratch_operands = 0 : i64, tpu.core_type = #tpu.core_type<tc>, window_params = [{transform_indices = @transform_0, window_bounds = array<i64: 512, 128>}, {transform_indices = @transform_1, window_bounds = array<i64: 128, 128>}, {transform_indices = @transform_2, window_bounds = array<i64: 1, 128>}, {transform_indices = @transform_3, window_bounds = array<i64: 512, 128>}]} {
    %c0 = arith.constant 0 : index
    %c0_0 = arith.constant 0 : index
    %0 = vector.load %arg2[%c0, %c0_0] : memref<512x128xbf16, #tpu.memory_space<vmem>>, vector<512x128xbf16>
    %c0_1 = arith.constant 0 : index
    %c0_2 = arith.constant 0 : index
    %1 = vector.load %arg3[%c0_1, %c0_2] : memref<128x128xbf16, #tpu.memory_space<vmem>>, vector<128x128xbf16>
    %cst = arith.constant dense<0.000000e+00> : vector<512x128xf32>
    %2 = tpu.matmul %0, %1, %cst {dimension_numbers = #tpu.dot_dimension_numbers<[1], [0], [0], [1], [0, 0, 1, 1], [], []>} : vector<512x128xbf16>, vector<128x128xbf16>, vector<512x128xf32> -> vector<512x128xf32>
    %c0_3 = arith.constant 0 : index
    %c0_4 = arith.constant 0 : index
    %3 = vector.load %arg4[%c0_3, %c0_4] : memref<1x128xf32, #tpu.memory_space<vmem>>, vector<1x128xf32>
    %4 = vector.broadcast %3 : vector<1x128xf32> to vector<512x128xf32>
    %5 = arith.addf %2, %4 : vector<512x128xf32>
    %cst_5 = arith.constant 0.000000e+00 : f32
    %6 = vector.broadcast %cst_5 : f32 to vector<512x128xf32>
    %7 = arith.maximumf %5, %6 : vector<512x128xf32>
    %8 = arith.truncf %7 : vector<512x128xf32> to vector<512x128xbf16>
    %c0_6 = arith.constant 0 : index
    %c0_7 = arith.constant 0 : index
    %9 = vector.load %arg5[%c0_6, %c0_7] : memref<512x128xbf16, #tpu.memory_space<vmem>>, vector<512x128xbf16>
    tpu.vector_store %arg5[%c0_6, %c0_7], %8 {strides = array<i32>} : memref<512x128xbf16, #tpu.memory_space<vmem>>, vector<512x128xbf16>,
    return
  }
  func.func @transform_0(%arg0: i32, %arg1: i32) -> (i32, i32) {
    %c0_i32 = arith.constant 0 : i32
    %c0_i32_0 = arith.constant 0 : i32
    return %arg1, %c0_i32 : i32, i32
  }
  func.func @transform_1(%arg0: i32, %arg1: i32) -> (i32, i32) {
    %c0_i32 = arith.constant 0 : i32
    %c0_i32_0 = arith.constant 0 : i32
    return %c0_i32, %arg0 : i32, i32
  }
  func.func @transform_2(%arg0: i32, %arg1: i32) -> (i32, i32) {
    %c0_i32 = arith.constant 0 : i32
    %c0_i32_0 = arith.constant 0 : i32
    return %c0_i32, %arg0 : i32, i32
  }
  func.func @transform_3(%arg0: i32, %arg1: i32) -> (i32, i32) {
    %c0_i32 = arith.constant 0 : i32
    return %arg1, %arg0 : i32, i32
  }
}

module attributes {stable_mosaic.version = 11 : i64} {
  func.func @kernel(%arg0: i32, %arg1: memref<16x2x8x8xbf16, #tpu.memory_space<vmem>>, %arg2: memref<16x8x4xbf16, #tpu.memory_space<vmem>>) attributes {dimension_semantics = [#tpu.dimension_semantics<parallel>], iteration_bounds = array<i64: 2>, scalar_prefetch = 0 : i64, scratch_operands = 0 : i64, tpu.core_type = #tpu.core_type<tc>, window_params = [{transform_indices = @transform_0, window_bounds = array<i64: 16, 2, 8, 8>}, {transform_indices = @transform_1, window_bounds = array<i64: 16, 8, 4>}]} {
    %c0 = arith.constant 0 : index
    %c0_0 = arith.constant 0 : index
    %c0_1 = arith.constant 0 : index
    %c0_2 = arith.constant 0 : index
    %0 = vector.load %arg1[%c0, %c0_0, %c0_1, %c0_2] : memref<16x2x8x8xbf16, #tpu.memory_space<vmem>>, vector<16x2x8x8xbf16>
    %cst = arith.constant dense<0xFF80> : vector<16x8x8xbf16>
    %1 = vector.multi_reduction <maximumf>, %0, %cst [1] : vector<16x2x8x8xbf16> to vector<16x8x8xbf16>
    %2 = vector.extract_strided_slice %1 {offsets = [0, 0, 0], sizes = [16, 8, 4], strides = [1, 1, 1]} : vector<16x8x8xbf16> to vector<16x8x4xbf16>
    %3 = vector.extract_strided_slice %1 {offsets = [0, 0, 4], sizes = [16, 8, 4], strides = [1, 1, 1]} : vector<16x8x8xbf16> to vector<16x8x4xbf16>
    %4 = arith.maximumf %2, %3 : vector<16x8x4xbf16>
    %c0_3 = arith.constant 0 : index
    %c0_4 = arith.constant 0 : index
    %c0_5 = arith.constant 0 : index
    %5 = vector.load %arg2[%c0_3, %c0_4, %c0_5] : memref<16x8x4xbf16, #tpu.memory_space<vmem>>, vector<16x8x4xbf16>
    tpu.vector_store %arg2[%c0_3, %c0_4, %c0_5], %4 {strides = array<i32>} : memref<16x8x4xbf16, #tpu.memory_space<vmem>>, vector<16x8x4xbf16>,
    return
  }
  func.func @transform_0(%arg0: i32) -> (i32, i32, i32, i32) {
    %c0_i32 = arith.constant 0 : i32
    %c0_i32_0 = arith.constant 0 : i32
    %c0_i32_1 = arith.constant 0 : i32
    %c0_i32_2 = arith.constant 0 : i32
    return %arg0, %c0_i32, %c0_i32_0, %c0_i32_1 : i32, i32, i32, i32
  }
  func.func @transform_1(%arg0: i32) -> (i32, i32, i32) {
    %c0_i32 = arith.constant 0 : i32
    %c0_i32_0 = arith.constant 0 : i32
    %c0_i32_1 = arith.constant 0 : i32
    return %arg0, %c0_i32, %c0_i32_0 : i32, i32, i32
  }
}

module attributes {stable_mosaic.version = 11 : i64} {
  func.func @kernel(%arg0: i32, %arg1: i32, %arg2: memref<128x128xbf16, #tpu.memory_space<vmem>>, %arg3: memref<128x128xbf16, #tpu.memory_space<vmem>>, %arg4: memref<1x128xf32, #tpu.memory_space<vmem>>, %arg5: memref<128x128xbf16, #tpu.memory_space<vmem>>) attributes {dimension_semantics = [#tpu.dimension_semantics<parallel>, #tpu.dimension_semantics<parallel>], iteration_bounds = array<i64: 1, 2>, scalar_prefetch = 0 : i64, scratch_operands = 0 : i64, tpu.core_type = #tpu.core_type<tc>, window_params = [{transform_indices = @transform_0, window_bounds = array<i64: 128, 128>}, {transform_indices = @transform_1, window_bounds = array<i64: 128, 128>}, {transform_indices = @transform_2, window_bounds = array<i64: 1, 128>}, {transform_indices = @transform_3, window_bounds = array<i64: 128, 128>}]} {
    %c0 = arith.constant 0 : index
    %c0_0 = arith.constant 0 : index
    %0 = vector.load %arg2[%c0, %c0_0] : memref<128x128xbf16, #tpu.memory_space<vmem>>, vector<128x128xbf16>
    %c0_1 = arith.constant 0 : index
    %c0_2 = arith.constant 0 : index
    %1 = vector.load %arg3[%c0_1, %c0_2] : memref<128x128xbf16, #tpu.memory_space<vmem>>, vector<128x128xbf16>
    %cst = arith.constant dense<0.000000e+00> : vector<128x128xf32>
    %2 = tpu.matmul %0, %1, %cst {dimension_numbers = #tpu.dot_dimension_numbers<[1], [0], [0], [1], [0, 0, 1, 1], [], []>} : vector<128x128xbf16>, vector<128x128xbf16>, vector<128x128xf32> -> vector<128x128xf32>
    %c0_3 = arith.constant 0 : index
    %c0_4 = arith.constant 0 : index
    %3 = vector.load %arg4[%c0_3, %c0_4] : memref<1x128xf32, #tpu.memory_space<vmem>>, vector<1x128xf32>
    %4 = vector.broadcast %3 : vector<1x128xf32> to vector<128x128xf32>
    %5 = arith.addf %2, %4 : vector<128x128xf32>
    %cst_5 = arith.constant 0.000000e+00 : f32
    %6 = vector.broadcast %cst_5 : f32 to vector<128x128xf32>
    %7 = arith.maximumf %5, %6 : vector<128x128xf32>
    %8 = arith.truncf %7 : vector<128x128xf32> to vector<128x128xbf16>
    %c0_6 = arith.constant 0 : index
    %c0_7 = arith.constant 0 : index
    %9 = vector.load %arg5[%c0_6, %c0_7] : memref<128x128xbf16, #tpu.memory_space<vmem>>, vector<128x128xbf16>
    tpu.vector_store %arg5[%c0_6, %c0_7], %8 {strides = array<i32>} : memref<128x128xbf16, #tpu.memory_space<vmem>>, vector<128x128xbf16>,
    return
  }
  func.func @transform_0(%arg0: i32, %arg1: i32) -> (i32, i32) {
    %c0_i32 = arith.constant 0 : i32
    %c0_i32_0 = arith.constant 0 : i32
    return %arg1, %c0_i32 : i32, i32
  }
  func.func @transform_1(%arg0: i32, %arg1: i32) -> (i32, i32) {
    %c0_i32 = arith.constant 0 : i32
    %c0_i32_0 = arith.constant 0 : i32
    return %c0_i32, %arg0 : i32, i32
  }
  func.func @transform_2(%arg0: i32, %arg1: i32) -> (i32, i32) {
    %c0_i32 = arith.constant 0 : i32
    %c0_i32_0 = arith.constant 0 : i32
    return %c0_i32, %arg0 : i32, i32
  }
  func.func @transform_3(%arg0: i32, %arg1: i32) -> (i32, i32) {
    %c0_i32 = arith.constant 0 : i32
    return %arg1, %arg0 : i32, i32
  }
}

module attributes {stable_mosaic.version = 11 : i64} {
  func.func @kernel(%arg0: i32, %arg1: memref<8x2x4x16xbf16, #tpu.memory_space<vmem>>, %arg2: memref<8x4x8xbf16, #tpu.memory_space<vmem>>) attributes {dimension_semantics = [#tpu.dimension_semantics<parallel>], iteration_bounds = array<i64: 2>, scalar_prefetch = 0 : i64, scratch_operands = 0 : i64, tpu.core_type = #tpu.core_type<tc>, window_params = [{transform_indices = @transform_0, window_bounds = array<i64: 8, 2, 4, 16>}, {transform_indices = @transform_1, window_bounds = array<i64: 8, 4, 8>}]} {
    %c0 = arith.constant 0 : index
    %c0_0 = arith.constant 0 : index
    %c0_1 = arith.constant 0 : index
    %c0_2 = arith.constant 0 : index
    %0 = vector.load %arg1[%c0, %c0_0, %c0_1, %c0_2] : memref<8x2x4x16xbf16, #tpu.memory_space<vmem>>, vector<8x2x4x16xbf16>
    %cst = arith.constant dense<0xFF80> : vector<8x4x16xbf16>
    %1 = vector.multi_reduction <maximumf>, %0, %cst [1] : vector<8x2x4x16xbf16> to vector<8x4x16xbf16>
    %2 = vector.extract_strided_slice %1 {offsets = [0, 0, 0], sizes = [8, 4, 8], strides = [1, 1, 1]} : vector<8x4x16xbf16> to vector<8x4x8xbf16>
    %3 = vector.extract_strided_slice %1 {offsets = [0, 0, 8], sizes = [8, 4, 8], strides = [1, 1, 1]} : vector<8x4x16xbf16> to vector<8x4x8xbf16>
    %4 = arith.maximumf %2, %3 : vector<8x4x8xbf16>
    %c0_3 = arith.constant 0 : index
    %c0_4 = arith.constant 0 : index
    %c0_5 = arith.constant 0 : index
    %5 = vector.load %arg2[%c0_3, %c0_4, %c0_5] : memref<8x4x8xbf16, #tpu.memory_space<vmem>>, vector<8x4x8xbf16>
    tpu.vector_store %arg2[%c0_3, %c0_4, %c0_5], %4 {strides = array<i32>} : memref<8x4x8xbf16, #tpu.memory_space<vmem>>, vector<8x4x8xbf16>,
    return
  }
  func.func @transform_0(%arg0: i32) -> (i32, i32, i32, i32) {
    %c0_i32 = arith.constant 0 : i32
    %c0_i32_0 = arith.constant 0 : i32
    %c0_i32_1 = arith.constant 0 : i32
    %c0_i32_2 = arith.constant 0 : i32
    return %arg0, %c0_i32, %c0_i32_0, %c0_i32_1 : i32, i32, i32, i32
  }
  func.func @transform_1(%arg0: i32) -> (i32, i32, i32) {
    %c0_i32 = arith.constant 0 : i32
    %c0_i32_0 = arith.constant 0 : i32
    %c0_i32_1 = arith.constant 0 : i32
    return %arg0, %c0_i32, %c0_i32_0 : i32, i32, i32
  }
}

module attributes {stable_mosaic.version = 11 : i64} {
  func.func @kernel(%arg0: i32, %arg1: i32, %arg2: memref<32x128xbf16, #tpu.memory_space<vmem>>, %arg3: memref<128x128xbf16, #tpu.memory_space<vmem>>, %arg4: memref<1x128xf32, #tpu.memory_space<vmem>>, %arg5: memref<32x128xbf16, #tpu.memory_space<vmem>>) attributes {dimension_semantics = [#tpu.dimension_semantics<parallel>, #tpu.dimension_semantics<parallel>], iteration_bounds = array<i64: 1, 2>, scalar_prefetch = 0 : i64, scratch_operands = 0 : i64, tpu.core_type = #tpu.core_type<tc>, window_params = [{transform_indices = @transform_0, window_bounds = array<i64: 32, 128>}, {transform_indices = @transform_1, window_bounds = array<i64: 128, 128>}, {transform_indices = @transform_2, window_bounds = array<i64: 1, 128>}, {transform_indices = @transform_3, window_bounds = array<i64: 32, 128>}]} {
    %c0 = arith.constant 0 : index
    %c0_0 = arith.constant 0 : index
    %0 = vector.load %arg2[%c0, %c0_0] : memref<32x128xbf16, #tpu.memory_space<vmem>>, vector<32x128xbf16>
    %c0_1 = arith.constant 0 : index
    %c0_2 = arith.constant 0 : index
    %1 = vector.load %arg3[%c0_1, %c0_2] : memref<128x128xbf16, #tpu.memory_space<vmem>>, vector<128x128xbf16>
    %cst = arith.constant dense<0.000000e+00> : vector<32x128xf32>
    %2 = tpu.matmul %0, %1, %cst {dimension_numbers = #tpu.dot_dimension_numbers<[1], [0], [0], [1], [0, 0, 1, 1], [], []>} : vector<32x128xbf16>, vector<128x128xbf16>, vector<32x128xf32> -> vector<32x128xf32>
    %c0_3 = arith.constant 0 : index
    %c0_4 = arith.constant 0 : index
    %3 = vector.load %arg4[%c0_3, %c0_4] : memref<1x128xf32, #tpu.memory_space<vmem>>, vector<1x128xf32>
    %4 = vector.broadcast %3 : vector<1x128xf32> to vector<32x128xf32>
    %5 = arith.addf %2, %4 : vector<32x128xf32>
    %cst_5 = arith.constant 0.000000e+00 : f32
    %6 = vector.broadcast %cst_5 : f32 to vector<32x128xf32>
    %7 = arith.maximumf %5, %6 : vector<32x128xf32>
    %8 = arith.truncf %7 : vector<32x128xf32> to vector<32x128xbf16>
    %c0_6 = arith.constant 0 : index
    %c0_7 = arith.constant 0 : index
    %9 = vector.load %arg5[%c0_6, %c0_7] : memref<32x128xbf16, #tpu.memory_space<vmem>>, vector<32x128xbf16>
    tpu.vector_store %arg5[%c0_6, %c0_7], %8 {strides = array<i32>} : memref<32x128xbf16, #tpu.memory_space<vmem>>, vector<32x128xbf16>,
    return
  }
  func.func @transform_0(%arg0: i32, %arg1: i32) -> (i32, i32) {
    %c0_i32 = arith.constant 0 : i32
    %c0_i32_0 = arith.constant 0 : i32
    return %arg1, %c0_i32 : i32, i32
  }
  func.func @transform_1(%arg0: i32, %arg1: i32) -> (i32, i32) {
    %c0_i32 = arith.constant 0 : i32
    %c0_i32_0 = arith.constant 0 : i32
    return %c0_i32, %arg0 : i32, i32
  }
  func.func @transform_2(%arg0: i32, %arg1: i32) -> (i32, i32) {
    %c0_i32 = arith.constant 0 : i32
    %c0_i32_0 = arith.constant 0 : i32
    return %c0_i32, %arg0 : i32, i32
  }
  func.func @transform_3(%arg0: i32, %arg1: i32) -> (i32, i32) {
    %c0_i32 = arith.constant 0 : i32
    return %arg1, %arg0 : i32, i32
  }
}

module attributes {stable_mosaic.version = 11 : i64} {
  func.func @kernel(%arg0: i32, %arg1: memref<4x2x4x16xbf16, #tpu.memory_space<vmem>>, %arg2: memref<4x4x16xbf16, #tpu.memory_space<vmem>>) attributes {dimension_semantics = [#tpu.dimension_semantics<parallel>], iteration_bounds = array<i64: 2>, scalar_prefetch = 0 : i64, scratch_operands = 0 : i64, tpu.core_type = #tpu.core_type<tc>, window_params = [{transform_indices = @transform_0, window_bounds = array<i64: 4, 2, 4, 16>}, {transform_indices = @transform_1, window_bounds = array<i64: 4, 4, 16>}]} {
    %c0 = arith.constant 0 : index
    %c0_0 = arith.constant 0 : index
    %c0_1 = arith.constant 0 : index
    %c0_2 = arith.constant 0 : index
    %0 = vector.load %arg1[%c0, %c0_0, %c0_1, %c0_2] : memref<4x2x4x16xbf16, #tpu.memory_space<vmem>>, vector<4x2x4x16xbf16>
    %cst = arith.constant dense<0xFF80> : vector<4x4x16xbf16>
    %1 = vector.multi_reduction <maximumf>, %0, %cst [1] : vector<4x2x4x16xbf16> to vector<4x4x16xbf16>
    %c0_3 = arith.constant 0 : index
    %c0_4 = arith.constant 0 : index
    %c0_5 = arith.constant 0 : index
    %2 = vector.load %arg2[%c0_3, %c0_4, %c0_5] : memref<4x4x16xbf16, #tpu.memory_space<vmem>>, vector<4x4x16xbf16>
    tpu.vector_store %arg2[%c0_3, %c0_4, %c0_5], %1 {strides = array<i32>} : memref<4x4x16xbf16, #tpu.memory_space<vmem>>, vector<4x4x16xbf16>,
    return
  }
  func.func @transform_0(%arg0: i32) -> (i32, i32, i32, i32) {
    %c0_i32 = arith.constant 0 : i32
    %c0_i32_0 = arith.constant 0 : i32
    %c0_i32_1 = arith.constant 0 : i32
    %c0_i32_2 = arith.constant 0 : i32
    return %arg0, %c0_i32, %c0_i32_0, %c0_i32_1 : i32, i32, i32, i32
  }
  func.func @transform_1(%arg0: i32) -> (i32, i32, i32) {
    %c0_i32 = arith.constant 0 : i32
    %c0_i32_0 = arith.constant 0 : i32
    %c0_i32_1 = arith.constant 0 : i32
    return %arg0, %c0_i32, %c0_i32_0 : i32, i32, i32
  }
}

module attributes {stable_mosaic.version = 11 : i64} {
  func.func @kernel(%arg0: i32, %arg1: i32, %arg2: memref<32x256xbf16, #tpu.memory_space<vmem>>, %arg3: memref<256x128xbf16, #tpu.memory_space<vmem>>, %arg4: memref<1x128xf32, #tpu.memory_space<vmem>>, %arg5: memref<32x128xbf16, #tpu.memory_space<vmem>>) attributes {dimension_semantics = [#tpu.dimension_semantics<parallel>, #tpu.dimension_semantics<parallel>], iteration_bounds = array<i64: 1, 2>, scalar_prefetch = 0 : i64, scratch_operands = 0 : i64, tpu.core_type = #tpu.core_type<tc>, window_params = [{transform_indices = @transform_0, window_bounds = array<i64: 32, 256>}, {transform_indices = @transform_1, window_bounds = array<i64: 256, 128>}, {transform_indices = @transform_2, window_bounds = array<i64: 1, 128>}, {transform_indices = @transform_3, window_bounds = array<i64: 32, 128>}]} {
    %c0 = arith.constant 0 : index
    %c0_0 = arith.constant 0 : index
    %0 = vector.load %arg2[%c0, %c0_0] : memref<32x256xbf16, #tpu.memory_space<vmem>>, vector<32x256xbf16>
    %c0_1 = arith.constant 0 : index
    %c0_2 = arith.constant 0 : index
    %1 = vector.load %arg3[%c0_1, %c0_2] : memref<256x128xbf16, #tpu.memory_space<vmem>>, vector<256x128xbf16>
    %cst = arith.constant dense<0.000000e+00> : vector<32x128xf32>
    %2 = tpu.matmul %0, %1, %cst {dimension_numbers = #tpu.dot_dimension_numbers<[1], [0], [0], [1], [0, 0, 1, 1], [], []>} : vector<32x256xbf16>, vector<256x128xbf16>, vector<32x128xf32> -> vector<32x128xf32>
    %c0_3 = arith.constant 0 : index
    %c0_4 = arith.constant 0 : index
    %3 = vector.load %arg4[%c0_3, %c0_4] : memref<1x128xf32, #tpu.memory_space<vmem>>, vector<1x128xf32>
    %4 = vector.broadcast %3 : vector<1x128xf32> to vector<32x128xf32>
    %5 = arith.addf %2, %4 : vector<32x128xf32>
    %cst_5 = arith.constant 0.000000e+00 : f32
    %6 = vector.broadcast %cst_5 : f32 to vector<32x128xf32>
    %7 = arith.maximumf %5, %6 : vector<32x128xf32>
    %8 = arith.truncf %7 : vector<32x128xf32> to vector<32x128xbf16>
    %c0_6 = arith.constant 0 : index
    %c0_7 = arith.constant 0 : index
    %9 = vector.load %arg5[%c0_6, %c0_7] : memref<32x128xbf16, #tpu.memory_space<vmem>>, vector<32x128xbf16>
    tpu.vector_store %arg5[%c0_6, %c0_7], %8 {strides = array<i32>} : memref<32x128xbf16, #tpu.memory_space<vmem>>, vector<32x128xbf16>,
    return
  }
  func.func @transform_0(%arg0: i32, %arg1: i32) -> (i32, i32) {
    %c0_i32 = arith.constant 0 : i32
    %c0_i32_0 = arith.constant 0 : i32
    return %arg1, %c0_i32 : i32, i32
  }
  func.func @transform_1(%arg0: i32, %arg1: i32) -> (i32, i32) {
    %c0_i32 = arith.constant 0 : i32
    %c0_i32_0 = arith.constant 0 : i32
    return %c0_i32, %arg0 : i32, i32
  }
  func.func @transform_2(%arg0: i32, %arg1: i32) -> (i32, i32) {
    %c0_i32 = arith.constant 0 : i32
    %c0_i32_0 = arith.constant 0 : i32
    return %c0_i32, %arg0 : i32, i32
  }
  func.func @transform_3(%arg0: i32, %arg1: i32) -> (i32, i32) {
    %c0_i32 = arith.constant 0 : i32
    return %arg1, %arg0 : i32, i32
  }
}

module attributes {stable_mosaic.version = 11 : i64} {
  func.func @kernel(%arg0: i32, %arg1: i32, %arg2: memref<16x256xbf16, #tpu.memory_space<vmem>>, %arg3: memref<256x128xbf16, #tpu.memory_space<vmem>>, %arg4: memref<1x128xf32, #tpu.memory_space<vmem>>, %arg5: memref<16x128xbf16, #tpu.memory_space<vmem>>, %arg6: memref<2x128xf32, #tpu.memory_space<vmem>>) attributes {dimension_semantics = [#tpu.dimension_semantics<parallel>, #tpu.dimension_semantics<arbitrary>], iteration_bounds = array<i64: 1, 2>, scalar_prefetch = 0 : i64, scratch_operands = 0 : i64, tpu.core_type = #tpu.core_type<tc>, window_params = [{transform_indices = @transform_0, window_bounds = array<i64: 16, 256>}, {transform_indices = @transform_1, window_bounds = array<i64: 256, 128>}, {transform_indices = @transform_2, window_bounds = array<i64: 1, 128>}, {transform_indices = @transform_3, window_bounds = array<i64: 16, 128>}, {transform_indices = @transform_4, window_bounds = array<i64: 2, 128>}]} {
    %c0_i32 = arith.constant 0 : i32
    %0 = arith.cmpi eq, %arg1, %c0_i32 : i32
    %1 = arith.extui %0 : i1 to i32
    %c0_i32_0 = arith.constant 0 : i32
    %2 = arith.cmpi ne, %1, %c0_i32_0 : i32
    scf.if %2 {
      %cst_14 = arith.constant 0.000000e+00 : f32
      %20 = vector.broadcast %cst_14 : f32 to vector<2x128xf32>
      %c0_15 = arith.constant 0 : index
      %c0_16 = arith.constant 0 : index
      %21 = vector.load %arg6[%c0_15, %c0_16] : memref<2x128xf32, #tpu.memory_space<vmem>>, vector<2x128xf32>
      tpu.vector_store %arg6[%c0_15, %c0_16], %20 {strides = array<i32>} : memref<2x128xf32, #tpu.memory_space<vmem>>, vector<2x128xf32>,
    } else {
    }
    %c0 = arith.constant 0 : index
    %c0_1 = arith.constant 0 : index
    %3 = vector.load %arg2[%c0, %c0_1] : memref<16x256xbf16, #tpu.memory_space<vmem>>, vector<16x256xbf16>
    %c0_2 = arith.constant 0 : index
    %c0_3 = arith.constant 0 : index
    %4 = vector.load %arg3[%c0_2, %c0_3] : memref<256x128xbf16, #tpu.memory_space<vmem>>, vector<256x128xbf16>
    %cst = arith.constant dense<0.000000e+00> : vector<16x128xf32>
    %5 = tpu.matmul %3, %4, %cst {dimension_numbers = #tpu.dot_dimension_numbers<[1], [0], [0], [1], [0, 0, 1, 1], [], []>} : vector<16x256xbf16>, vector<256x128xbf16>, vector<16x128xf32> -> vector<16x128xf32>
    %c0_4 = arith.constant 0 : index
    %c0_5 = arith.constant 0 : index
    %6 = vector.load %arg4[%c0_4, %c0_5] : memref<1x128xf32, #tpu.memory_space<vmem>>, vector<1x128xf32>
    %7 = vector.broadcast %6 : vector<1x128xf32> to vector<16x128xf32>
    %8 = arith.addf %5, %7 : vector<16x128xf32>
    %cst_6 = arith.constant dense<0.000000e+00> : vector<128xf32>
    %9 = vector.multi_reduction <add>, %8, %cst_6 [0] : vector<16x128xf32> to vector<128xf32>
    %10 = vector.shape_cast %9 : vector<128xf32> to vector<1x128xf32>
    %11 = arith.mulf %8, %8 : vector<16x128xf32>
    %cst_7 = arith.constant dense<0.000000e+00> : vector<128xf32>
    %12 = vector.multi_reduction <add>, %11, %cst_7 [0] : vector<16x128xf32> to vector<128xf32>
    %13 = vector.shape_cast %12 : vector<128xf32> to vector<1x128xf32>
    %c0_8 = arith.constant 0 : index
    %c0_9 = arith.constant 0 : index
    %14 = vector.load %arg6[%c0_8, %c0_9] : memref<2x128xf32, #tpu.memory_space<vmem>>, vector<2x128xf32>
    %15 = tpu.concatenate %10, %13 in 0 : vector<1x128xf32>, vector<1x128xf32> -> vector<2x128xf32>
    %16 = arith.addf %14, %15 : vector<2x128xf32>
    %c0_10 = arith.constant 0 : index
    %c0_11 = arith.constant 0 : index
    %17 = vector.load %arg6[%c0_10, %c0_11] : memref<2x128xf32, #tpu.memory_space<vmem>>, vector<2x128xf32>
    tpu.vector_store %arg6[%c0_10, %c0_11], %16 {strides = array<i32>} : memref<2x128xf32, #tpu.memory_space<vmem>>, vector<2x128xf32>,
    %18 = arith.truncf %8 : vector<16x128xf32> to vector<16x128xbf16>
    %c0_12 = arith.constant 0 : index
    %c0_13 = arith.constant 0 : index
    %19 = vector.load %arg5[%c0_12, %c0_13] : memref<16x128xbf16, #tpu.memory_space<vmem>>, vector<16x128xbf16>
    tpu.vector_store %arg5[%c0_12, %c0_13], %18 {strides = array<i32>} : memref<16x128xbf16, #tpu.memory_space<vmem>>, vector<16x128xbf16>,
    return
  }
  func.func @transform_0(%arg0: i32, %arg1: i32) -> (i32, i32) {
    %c0_i32 = arith.constant 0 : i32
    %c0_i32_0 = arith.constant 0 : i32
    return %arg1, %c0_i32 : i32, i32
  }
  func.func @transform_1(%arg0: i32, %arg1: i32) -> (i32, i32) {
    %c0_i32 = arith.constant 0 : i32
    %c0_i32_0 = arith.constant 0 : i32
    return %c0_i32, %arg0 : i32, i32
  }
  func.func @transform_2(%arg0: i32, %arg1: i32) -> (i32, i32) {
    %c0_i32 = arith.constant 0 : i32
    %c0_i32_0 = arith.constant 0 : i32
    return %c0_i32, %arg0 : i32, i32
  }
  func.func @transform_3(%arg0: i32, %arg1: i32) -> (i32, i32) {
    %c0_i32 = arith.constant 0 : i32
    return %arg1, %arg0 : i32, i32
  }
  func.func @transform_4(%arg0: i32, %arg1: i32) -> (i32, i32) {
    %c0_i32 = arith.constant 0 : i32
    %c0_i32_0 = arith.constant 0 : i32
    return %c0_i32, %arg0 : i32, i32
  }
}

module attributes {stable_mosaic.version = 11 : i64} {
  func.func @kernel(%arg0: i32, %arg1: memref<16x128xbf16, #tpu.memory_space<vmem>>, %arg2: memref<2x128xf32, #tpu.memory_space<vmem>>, %arg3: memref<1x128xf32, #tpu.memory_space<vmem>>, %arg4: memref<1x128xf32, #tpu.memory_space<vmem>>, %arg5: memref<16x128xbf16, #tpu.memory_space<vmem>>) attributes {dimension_semantics = [#tpu.dimension_semantics<parallel>], iteration_bounds = array<i64: 2>, scalar_prefetch = 0 : i64, scratch_operands = 0 : i64, tpu.core_type = #tpu.core_type<tc>, window_params = [{transform_indices = @transform_0, window_bounds = array<i64: 16, 128>}, {pipeline_mode = #tpu.pipeline_mode<synchronous>, transform_indices = @transform_1, window_bounds = array<i64: 2, 128>}, {pipeline_mode = #tpu.pipeline_mode<synchronous>, transform_indices = @transform_2, window_bounds = array<i64: 1, 128>}, {pipeline_mode = #tpu.pipeline_mode<synchronous>, transform_indices = @transform_3, window_bounds = array<i64: 1, 128>}, {transform_indices = @transform_4, window_bounds = array<i64: 16, 128>}]} {
    %c0 = arith.constant 0 : index
    %c0_0 = arith.constant 0 : index
    %0 = vector.load %arg2[%c0, %c0_0] : memref<2x128xf32, #tpu.memory_space<vmem>>, vector<1x128xf32>
    %cst = arith.constant 3.125000e-02 : f32
    %1 = vector.broadcast %cst : f32 to vector<1x128xf32>
    %2 = arith.mulf %0, %1 : vector<1x128xf32>
    %c1 = arith.constant 1 : index
    %c0_1 = arith.constant 0 : index
    %3 = vector.load %arg2[%c1, %c0_1] : memref<2x128xf32, #tpu.memory_space<vmem>>, vector<1x128xf32>
    %cst_2 = arith.constant 3.125000e-02 : f32
    %4 = vector.broadcast %cst_2 : f32 to vector<1x128xf32>
    %5 = arith.mulf %3, %4 : vector<1x128xf32>
    %6 = arith.mulf %2, %2 : vector<1x128xf32>
    %7 = arith.subf %5, %6 : vector<1x128xf32>
    %cst_3 = arith.constant 0.000000e+00 : f32
    %8 = vector.broadcast %cst_3 : f32 to vector<1x128xf32>
    %9 = arith.maximumf %7, %8 : vector<1x128xf32>
    %c0_4 = arith.constant 0 : index
    %c0_5 = arith.constant 0 : index
    %10 = vector.load %arg3[%c0_4, %c0_5] : memref<1x128xf32, #tpu.memory_space<vmem>>, vector<1x128xf32>
    %cst_6 = arith.constant 9.99999974E-6 : f32
    %11 = vector.broadcast %cst_6 : f32 to vector<1x128xf32>
    %12 = arith.addf %9, %11 : vector<1x128xf32>
    %13 = math.rsqrt %12 : vector<1x128xf32>
    %14 = arith.mulf %10, %13 : vector<1x128xf32>
    %c0_7 = arith.constant 0 : index
    %c0_8 = arith.constant 0 : index
    %15 = vector.load %arg4[%c0_7, %c0_8] : memref<1x128xf32, #tpu.memory_space<vmem>>, vector<1x128xf32>
    %16 = arith.mulf %2, %14 : vector<1x128xf32>
    %17 = arith.subf %15, %16 : vector<1x128xf32>
    %c0_9 = arith.constant 0 : index
    %c0_10 = arith.constant 0 : index
    %18 = vector.load %arg1[%c0_9, %c0_10] : memref<16x128xbf16, #tpu.memory_space<vmem>>, vector<16x128xbf16>
    %19 = arith.extf %18 : vector<16x128xbf16> to vector<16x128xf32>
    %20 = vector.broadcast %14 : vector<1x128xf32> to vector<16x128xf32>
    %21 = arith.mulf %19, %20 : vector<16x128xf32>
    %22 = vector.broadcast %17 : vector<1x128xf32> to vector<16x128xf32>
    %23 = arith.addf %21, %22 : vector<16x128xf32>
    %cst_11 = arith.constant 0.000000e+00 : f32
    %24 = vector.broadcast %cst_11 : f32 to vector<16x128xf32>
    %25 = arith.maximumf %23, %24 : vector<16x128xf32>
    %26 = arith.truncf %25 : vector<16x128xf32> to vector<16x128xbf16>
    %c0_12 = arith.constant 0 : index
    %c0_13 = arith.constant 0 : index
    %27 = vector.load %arg5[%c0_12, %c0_13] : memref<16x128xbf16, #tpu.memory_space<vmem>>, vector<16x128xbf16>
    tpu.vector_store %arg5[%c0_12, %c0_13], %26 {strides = array<i32>} : memref<16x128xbf16, #tpu.memory_space<vmem>>, vector<16x128xbf16>,
    return
  }
  func.func @transform_0(%arg0: i32) -> (i32, i32) {
    %c0_i32 = arith.constant 0 : i32
    %c0_i32_0 = arith.constant 0 : i32
    return %arg0, %c0_i32 : i32, i32
  }
  func.func @transform_1(%arg0: i32) -> (i32, i32) {
    %c0_i32 = arith.constant 0 : i32
    %c0_i32_0 = arith.constant 0 : i32
    %c0_i32_1 = arith.constant 0 : i32
    return %c0_i32, %c0_i32_0 : i32, i32
  }
  func.func @transform_2(%arg0: i32) -> (i32, i32) {
    %c0_i32 = arith.constant 0 : i32
    %c0_i32_0 = arith.constant 0 : i32
    %c0_i32_1 = arith.constant 0 : i32
    return %c0_i32, %c0_i32_0 : i32, i32
  }
  func.func @transform_3(%arg0: i32) -> (i32, i32) {
    %c0_i32 = arith.constant 0 : i32
    %c0_i32_0 = arith.constant 0 : i32
    %c0_i32_1 = arith.constant 0 : i32
    return %c0_i32, %c0_i32_0 : i32, i32
  }
  func.func @transform_4(%arg0: i32) -> (i32, i32) {
    %c0_i32 = arith.constant 0 : i32
    %c0_i32_0 = arith.constant 0 : i32
    return %arg0, %c0_i32 : i32, i32
  }
}

module attributes {stable_mosaic.version = 11 : i64} {
  func.func @kernel(%arg0: i32, %arg1: i32, %arg2: memref<16x384xbf16, #tpu.memory_space<vmem>>, %arg3: memref<384x128xbf16, #tpu.memory_space<vmem>>, %arg4: memref<1x128xf32, #tpu.memory_space<vmem>>, %arg5: memref<16x128xbf16, #tpu.memory_space<vmem>>, %arg6: memref<2x128xf32, #tpu.memory_space<vmem>>) attributes {dimension_semantics = [#tpu.dimension_semantics<parallel>, #tpu.dimension_semantics<arbitrary>], iteration_bounds = array<i64: 1, 2>, scalar_prefetch = 0 : i64, scratch_operands = 0 : i64, tpu.core_type = #tpu.core_type<tc>, window_params = [{transform_indices = @transform_0, window_bounds = array<i64: 16, 384>}, {transform_indices = @transform_1, window_bounds = array<i64: 384, 128>}, {transform_indices = @transform_2, window_bounds = array<i64: 1, 128>}, {transform_indices = @transform_3, window_bounds = array<i64: 16, 128>}, {transform_indices = @transform_4, window_bounds = array<i64: 2, 128>}]} {
    %c0_i32 = arith.constant 0 : i32
    %0 = arith.cmpi eq, %arg1, %c0_i32 : i32
    %1 = arith.extui %0 : i1 to i32
    %c0_i32_0 = arith.constant 0 : i32
    %2 = arith.cmpi ne, %1, %c0_i32_0 : i32
    scf.if %2 {
      %cst_14 = arith.constant 0.000000e+00 : f32
      %20 = vector.broadcast %cst_14 : f32 to vector<2x128xf32>
      %c0_15 = arith.constant 0 : index
      %c0_16 = arith.constant 0 : index
      %21 = vector.load %arg6[%c0_15, %c0_16] : memref<2x128xf32, #tpu.memory_space<vmem>>, vector<2x128xf32>
      tpu.vector_store %arg6[%c0_15, %c0_16], %20 {strides = array<i32>} : memref<2x128xf32, #tpu.memory_space<vmem>>, vector<2x128xf32>,
    } else {
    }
    %c0 = arith.constant 0 : index
    %c0_1 = arith.constant 0 : index
    %3 = vector.load %arg2[%c0, %c0_1] : memref<16x384xbf16, #tpu.memory_space<vmem>>, vector<16x384xbf16>
    %c0_2 = arith.constant 0 : index
    %c0_3 = arith.constant 0 : index
    %4 = vector.load %arg3[%c0_2, %c0_3] : memref<384x128xbf16, #tpu.memory_space<vmem>>, vector<384x128xbf16>
    %cst = arith.constant dense<0.000000e+00> : vector<16x128xf32>
    %5 = tpu.matmul %3, %4, %cst {dimension_numbers = #tpu.dot_dimension_numbers<[1], [0], [0], [1], [0, 0, 1, 1], [], []>} : vector<16x384xbf16>, vector<384x128xbf16>, vector<16x128xf32> -> vector<16x128xf32>
    %c0_4 = arith.constant 0 : index
    %c0_5 = arith.constant 0 : index
    %6 = vector.load %arg4[%c0_4, %c0_5] : memref<1x128xf32, #tpu.memory_space<vmem>>, vector<1x128xf32>
    %7 = vector.broadcast %6 : vector<1x128xf32> to vector<16x128xf32>
    %8 = arith.addf %5, %7 : vector<16x128xf32>
    %cst_6 = arith.constant dense<0.000000e+00> : vector<128xf32>
    %9 = vector.multi_reduction <add>, %8, %cst_6 [0] : vector<16x128xf32> to vector<128xf32>
    %10 = vector.shape_cast %9 : vector<128xf32> to vector<1x128xf32>
    %11 = arith.mulf %8, %8 : vector<16x128xf32>
    %cst_7 = arith.constant dense<0.000000e+00> : vector<128xf32>
    %12 = vector.multi_reduction <add>, %11, %cst_7 [0] : vector<16x128xf32> to vector<128xf32>
    %13 = vector.shape_cast %12 : vector<128xf32> to vector<1x128xf32>
    %c0_8 = arith.constant 0 : index
    %c0_9 = arith.constant 0 : index
    %14 = vector.load %arg6[%c0_8, %c0_9] : memref<2x128xf32, #tpu.memory_space<vmem>>, vector<2x128xf32>
    %15 = tpu.concatenate %10, %13 in 0 : vector<1x128xf32>, vector<1x128xf32> -> vector<2x128xf32>
    %16 = arith.addf %14, %15 : vector<2x128xf32>
    %c0_10 = arith.constant 0 : index
    %c0_11 = arith.constant 0 : index
    %17 = vector.load %arg6[%c0_10, %c0_11] : memref<2x128xf32, #tpu.memory_space<vmem>>, vector<2x128xf32>
    tpu.vector_store %arg6[%c0_10, %c0_11], %16 {strides = array<i32>} : memref<2x128xf32, #tpu.memory_space<vmem>>, vector<2x128xf32>,
    %18 = arith.truncf %8 : vector<16x128xf32> to vector<16x128xbf16>
    %c0_12 = arith.constant 0 : index
    %c0_13 = arith.constant 0 : index
    %19 = vector.load %arg5[%c0_12, %c0_13] : memref<16x128xbf16, #tpu.memory_space<vmem>>, vector<16x128xbf16>
    tpu.vector_store %arg5[%c0_12, %c0_13], %18 {strides = array<i32>} : memref<16x128xbf16, #tpu.memory_space<vmem>>, vector<16x128xbf16>,
    return
  }
  func.func @transform_0(%arg0: i32, %arg1: i32) -> (i32, i32) {
    %c0_i32 = arith.constant 0 : i32
    %c0_i32_0 = arith.constant 0 : i32
    return %arg1, %c0_i32 : i32, i32
  }
  func.func @transform_1(%arg0: i32, %arg1: i32) -> (i32, i32) {
    %c0_i32 = arith.constant 0 : i32
    %c0_i32_0 = arith.constant 0 : i32
    return %c0_i32, %arg0 : i32, i32
  }
  func.func @transform_2(%arg0: i32, %arg1: i32) -> (i32, i32) {
    %c0_i32 = arith.constant 0 : i32
    %c0_i32_0 = arith.constant 0 : i32
    return %c0_i32, %arg0 : i32, i32
  }
  func.func @transform_3(%arg0: i32, %arg1: i32) -> (i32, i32) {
    %c0_i32 = arith.constant 0 : i32
    return %arg1, %arg0 : i32, i32
  }
  func.func @transform_4(%arg0: i32, %arg1: i32) -> (i32, i32) {
    %c0_i32 = arith.constant 0 : i32
    %c0_i32_0 = arith.constant 0 : i32
    return %c0_i32, %arg0 : i32, i32
  }
}

module attributes {stable_mosaic.version = 11 : i64} {
  func.func @kernel(%arg0: i32, %arg1: memref<2x2x4x32xbf16, #tpu.memory_space<vmem>>, %arg2: memref<2x4x32xbf16, #tpu.memory_space<vmem>>) attributes {dimension_semantics = [#tpu.dimension_semantics<parallel>], iteration_bounds = array<i64: 2>, scalar_prefetch = 0 : i64, scratch_operands = 0 : i64, tpu.core_type = #tpu.core_type<tc>, window_params = [{transform_indices = @transform_0, window_bounds = array<i64: 2, 2, 4, 32>}, {transform_indices = @transform_1, window_bounds = array<i64: 2, 4, 32>}]} {
    %c0 = arith.constant 0 : index
    %c0_0 = arith.constant 0 : index
    %c0_1 = arith.constant 0 : index
    %c0_2 = arith.constant 0 : index
    %0 = vector.load %arg1[%c0, %c0_0, %c0_1, %c0_2] : memref<2x2x4x32xbf16, #tpu.memory_space<vmem>>, vector<2x2x4x32xbf16>
    %cst = arith.constant dense<0xFF80> : vector<2x4x32xbf16>
    %1 = vector.multi_reduction <maximumf>, %0, %cst [1] : vector<2x2x4x32xbf16> to vector<2x4x32xbf16>
    %c0_3 = arith.constant 0 : index
    %c0_4 = arith.constant 0 : index
    %c0_5 = arith.constant 0 : index
    %2 = vector.load %arg2[%c0_3, %c0_4, %c0_5] : memref<2x4x32xbf16, #tpu.memory_space<vmem>>, vector<2x4x32xbf16>
    tpu.vector_store %arg2[%c0_3, %c0_4, %c0_5], %1 {strides = array<i32>} : memref<2x4x32xbf16, #tpu.memory_space<vmem>>, vector<2x4x32xbf16>,
    return
  }
  func.func @transform_0(%arg0: i32) -> (i32, i32, i32, i32) {
    %c0_i32 = arith.constant 0 : i32
    %c0_i32_0 = arith.constant 0 : i32
    %c0_i32_1 = arith.constant 0 : i32
    %c0_i32_2 = arith.constant 0 : i32
    return %arg0, %c0_i32, %c0_i32_0, %c0_i32_1 : i32, i32, i32, i32
  }
  func.func @transform_1(%arg0: i32) -> (i32, i32, i32) {
    %c0_i32 = arith.constant 0 : i32
    %c0_i32_0 = arith.constant 0 : i32
    %c0_i32_1 = arith.constant 0 : i32
    return %arg0, %c0_i32, %c0_i32_0 : i32, i32, i32
  }
}

module attributes {stable_mosaic.version = 11 : i64} {
  func.func @kernel(%arg0: i32, %arg1: i32, %arg2: memref<8x128xbf16, #tpu.memory_space<vmem>>, %arg3: memref<128x128xbf16, #tpu.memory_space<vmem>>, %arg4: memref<1x128xf32, #tpu.memory_space<vmem>>, %arg5: memref<8x128xf32, #tpu.memory_space<vmem>>) attributes {dimension_semantics = [#tpu.dimension_semantics<parallel>, #tpu.dimension_semantics<parallel>], iteration_bounds = array<i64: 1, 1>, scalar_prefetch = 0 : i64, scratch_operands = 0 : i64, tpu.core_type = #tpu.core_type<tc>, window_params = [{transform_indices = @transform_0, window_bounds = array<i64: 8, 128>}, {transform_indices = @transform_1, window_bounds = array<i64: 128, 128>}, {transform_indices = @transform_2, window_bounds = array<i64: 1, 128>}, {transform_indices = @transform_3, window_bounds = array<i64: 8, 128>}]} {
    %c0 = arith.constant 0 : index
    %c0_0 = arith.constant 0 : index
    %0 = vector.load %arg2[%c0, %c0_0] : memref<8x128xbf16, #tpu.memory_space<vmem>>, vector<8x128xbf16>
    %c0_1 = arith.constant 0 : index
    %c0_2 = arith.constant 0 : index
    %1 = vector.load %arg3[%c0_1, %c0_2] : memref<128x128xbf16, #tpu.memory_space<vmem>>, vector<128x128xbf16>
    %cst = arith.constant dense<0.000000e+00> : vector<8x128xf32>
    %2 = tpu.matmul %0, %1, %cst {dimension_numbers = #tpu.dot_dimension_numbers<[1], [0], [0], [1], [0, 0, 1, 1], [], []>} : vector<8x128xbf16>, vector<128x128xbf16>, vector<8x128xf32> -> vector<8x128xf32>
    %c0_3 = arith.constant 0 : index
    %c0_4 = arith.constant 0 : index
    %3 = vector.load %arg4[%c0_3, %c0_4] : memref<1x128xf32, #tpu.memory_space<vmem>>, vector<1x128xf32>
    %4 = vector.broadcast %3 : vector<1x128xf32> to vector<8x128xf32>
    %5 = arith.addf %2, %4 : vector<8x128xf32>
    %cst_5 = arith.constant 0.000000e+00 : f32
    %6 = vector.broadcast %cst_5 : f32 to vector<8x128xf32>
    %7 = arith.maximumf %5, %6 : vector<8x128xf32>
    %c0_6 = arith.constant 0 : index
    %c0_7 = arith.constant 0 : index
    %8 = vector.load %arg5[%c0_6, %c0_7] : memref<8x128xf32, #tpu.memory_space<vmem>>, vector<8x128xf32>
    tpu.vector_store %arg5[%c0_6, %c0_7], %7 {strides = array<i32>} : memref<8x128xf32, #tpu.memory_space<vmem>>, vector<8x128xf32>,
    return
  }
  func.func @transform_0(%arg0: i32, %arg1: i32) -> (i32, i32) {
    %c0_i32 = arith.constant 0 : i32
    %c0_i32_0 = arith.constant 0 : i32
    return %arg1, %c0_i32 : i32, i32
  }
  func.func @transform_1(%arg0: i32, %arg1: i32) -> (i32, i32) {
    %c0_i32 = arith.constant 0 : i32
    %c0_i32_0 = arith.constant 0 : i32
    return %c0_i32, %arg0 : i32, i32
  }
  func.func @transform_2(%arg0: i32, %arg1: i32) -> (i32, i32) {
    %c0_i32 = arith.constant 0 : i32
    %c0_i32_0 = arith.constant 0 : i32
    return %c0_i32, %arg0 : i32, i32
  }
  func.func @transform_3(%arg0: i32, %arg1: i32) -> (i32, i32) {
    %c0_i32 = arith.constant 0 : i32
    return %arg1, %arg0 : i32, i32
  }
}

</mosaic_0001>

<bundles_post_ra>
// kernel: vgg_forward.14
= control target key start
LH: loop header
LB: loop body
LE: loop exit
PB: predicated region body
PF: predicated region fallthrough
CT: control target
= control target key end

     0   :  { %s464_s6 = smov 0   ;;  %s645_s0 = inlined_call_operand.vmem [shape: bf16[32,2,8,8], index: 0, kind: input, shape index: {}]   ;;  %s646_s1 = inlined_call_operand.vmem [shape: bf16[32,8,4], index: 1, kind: output, shape index: {}]  }
   0x1 LB: > { %s423_s7 = sadd.s32 4294967295, %s451_s6   ;;  %p427_p0 = scmp.ge.s32.totalorder %s451_s6, 1  ;;  %s451_s6 = sphi %s464_s6, %s11_s6  }
   0x2   : > { %p89_p1 = scmp.lt.s32.totalorder %s451_s6, 3 }
   0x4   : > { %p90_p2 = pnand %p427_p0, %p89_p1 }
   0x5   : > { %s428_s8 = sshll.u32 (!%p90_p2), %s423_s7, 4  ;;  %vm156_vm0 = vcmask (!%p90_p2), 60416   ;;  %s453_s13 = smov (!%p90_p2), 124   ;;  %vm350_vm1 = vcmask (!%p90_p2), 27648  }
   0x6   : > { %93 = sbr.rel (%p90_p2) target bundleno = 167 (0xa7), region = 24  ;;  %p111_p3 = scmp.lt.s32.totalorder (!%p90_p2), %s428_s8, 31 }
   0xd   : > { %s648_s8 = smov (!%p111_p3, %s428_s8), 31 }
   0xe   : > { %s435_s9 = sshll.u32 %s648_s8, 3  ;;  %s432_s14 = sshll.u32 %s648_s8, 2 }
   0xf   : > { %s478_s12 = scalar_lea.vmem %s645_s0, %s435_s9  ;;  %s597_s17 = scalar_lea.vmem %s646_s1, %s432_s14 }
  0x10   : > { %v128_v0 = vld [vmem:[%s478_s12 + $0x10] sm:$0xf]  ;;  %v129_v1 = vld [vmem:[%s478_s12 + $0x14] sm:$0xf]  ;;  %v124_v2 = vld [vmem:[%s478_s12] sm:$0xf] }
  0x11   : > { %v173_v3 = vsel %vm156_vm0, %v128_v0, 4286644096  ;;  %v176_v4 = vsel %vm156_vm0, %v129_v1, 4286644096  ;;  %v125_v5 = vld [vmem:[%s478_s12 + $0x4] sm:$0xf] }
  0x12   : > { %v486_v6 = vmax.bf16 %v176_v4, %v173_v3  ;;  %v159_v7 = vsel %vm156_vm0, %v124_v2, 4286644096  ;;  %v162_v8 = vsel %vm156_vm0, %v125_v5, 4286644096  ;;  %v130_v9 = vld [vmem:[%s478_s12 + $0x18] sm:$0xf] }
  0x13   : > { %v491_v10 = vmax.bf16 %v162_v8, %v159_v7  ;;  %v131_v11 = vld [vmem:[%s478_s12 + $0x1c] sm:$0xf]  ;;  %v180_v12 = vsel %vm156_vm0, %v130_v9, 4286644096  ;;  %v126_v13 = vld [vmem:[%s478_s12 + $0x8] sm:$0xf] }
  0x14   : > { %290 = vrot.lane.b32.xlu1 %v486_v6, %s453_s13  ;;  %v183_v14 = vsel %vm156_vm0, %v131_v11, 4286644096  ;;  %v127_v15 = vld [vmem:[%s478_s12 + $0xc] sm:$0xf]  ;;  %v166_v16 = vsel %vm156_vm0, %v126_v13, 4286644096 }
  0x15   : > { %286 = vrot.lane.b32.xlu0 %v491_v10, %s453_s13  ;;  %v503_v17 = vmax.bf16 %v183_v14, %v180_v12  ;;  %v169_v18 = vsel %vm156_vm0, %v127_v15, 4286644096  ;;  %v134_v19 = vld [vmem:[%s478_s12 + $0x28] sm:$0xf]  ;;  %v135_v20 = vld [vmem:[%s478_s12 + $0x2c] sm:$0xf] }
  0x16   : > { %v508_v21 = vmax.bf16 %v169_v18, %v166_v16  ;;  %v194_v22 = vsel %vm156_vm0, %v134_v19, 4286644096  ;;  %v197_v23 = vsel %vm156_vm0, %v135_v20, 4286644096  ;;  %v132_v24 = vld [vmem:[%s478_s12 + $0x20] sm:$0xf] }
  0x17   : > { %v133_v25 = vld [vmem:[%s478_s12 + $0x24] sm:$0xf]  ;;  %v187_v26 = vsel %vm156_vm0, %v132_v24, 4286644096  ;;  %v138_v27 = vld [vmem:[%s478_s12 + $0x38] sm:$0xf]  ;;  %v518_v28 = vmax.bf16 %v197_v23, %v194_v22 }
  0x18   : > { %292 = vrot.lane.b32.xlu1 %v503_v17, %s453_s13  ;;  %v190_v29 = vsel %vm156_vm0, %v133_v25, 4286644096  ;;  %v139_v30 = vld [vmem:[%s478_s12 + $0x3c] sm:$0xf]  ;;  %v208_v31 = vsel %vm156_vm0, %v138_v27, 4286644096 }
  0x19   : > { %288 = vrot.lane.b32.xlu0 %v508_v21, %s453_s13  ;;  %v525_v32 = vmax.bf16 %v190_v29, %v187_v26  ;;  %v211_v33 = vsel %vm156_vm0, %v139_v30, 4286644096  ;;  %v136_v34 = vld [vmem:[%s478_s12 + $0x30] sm:$0xf]  ;;  %v137_v35 = vld [vmem:[%s478_s12 + $0x34] sm:$0xf] }
  0x1a   : > { %v201_v36 = vsel %vm156_vm0, %v136_v34, 4286644096  ;;  %v204_v37 = vsel %vm156_vm0, %v137_v35, 4286644096  ;;  %v142_v38 = vld [vmem:[%s478_s12 + $0x48] sm:$0xf]  ;;  %v537_v41 = vmax.bf16 %v211_v33, %v208_v31 }
  0x1b   : > { %v143_v39 = vld [vmem:[%s478_s12 + $0x4c] sm:$0xf]  ;;  %v140_v40 = vld [vmem:[%s478_s12 + $0x40] sm:$0xf]  ;;  %v222_v42 = vsel %vm156_vm0, %v142_v38, 4286644096  ;;  %v543_v44 = vmax.bf16 %v204_v37, %v201_v36 }
  0x1c   : > { %296 = vrot.lane.b32.xlu1 %v518_v28, %s453_s13  ;;  %v141_v43 = vld [vmem:[%s478_s12 + $0x44] sm:$0xf]  ;;  %v225_v45 = vsel %vm156_vm0, %v143_v39, 4286644096  ;;  %v215_v46 = vsel %vm156_vm0, %v140_v40, 4286644096 }
  0x1d   : > { %294 = vrot.lane.b32.xlu0 %v525_v32, %s453_s13  ;;  %v146_v47 = vld [vmem:[%s478_s12 + $0x58] sm:$0xf]  ;;  %v218_v48 = vsel %vm156_vm0, %v141_v43, 4286644096  ;;  %v147_v49 = vld [vmem:[%s478_s12 + $0x5c] sm:$0xf]  ;;  %v554_v52 = vmax.bf16 %v225_v45, %v222_v42 }
  0x1e   : > { %v144_v50 = vld [vmem:[%s478_s12 + $0x50] sm:$0xf]  ;;  %v145_v51 = vld [vmem:[%s478_s12 + $0x54] sm:$0xf]  ;;  %v236_v53 = vsel %vm156_vm0, %v146_v47, 4286644096  ;;  %v559_v54 = vmax.bf16 %v218_v48, %v215_v46 }
  0x1f   : > { %v239_v55 = vsel %vm156_vm0, %v147_v49, 4286644096  ;;  %v229_v56 = vsel %vm156_vm0, %v144_v50, 4286644096  ;;  %v150_v57 = vld [vmem:[%s478_s12 + $0x68] sm:$0xf] }
  0x20   : > { %300 = vrot.lane.b32.xlu1 %v537_v41, %s453_s13  ;;  %v232_v58 = vsel %vm156_vm0, %v145_v51, 4286644096  ;;  %v151_v59 = vld [vmem:[%s478_s12 + $0x6c] sm:$0xf]  ;;  %v148_v60 = vld [vmem:[%s478_s12 + $0x60] sm:$0xf]  ;;  %v570_v62 = vmax.bf16 %v239_v55, %v236_v53 }
  0x21   : > { %298 = vrot.lane.b32.xlu0 %v543_v44, %s453_s13  ;;  %v149_v61 = vld [vmem:[%s478_s12 + $0x64] sm:$0xf]  ;;  %v234_v63 = vmax.bf16 %v232_v58, %v229_v56  ;;  %v250_v0 = vsel %vm156_vm0, %v150_v57, 4286644096  ;;  %v253_v1 = vsel %vm156_vm0, %v151_v59, 4286644096 }
  0x22   : > { %v243_v2 = vsel %vm156_vm0, %v148_v60, 4286644096  ;;  %v246_v3 = vsel %vm156_vm0, %v149_v61, 4286644096  ;;  %v154_v4 = vld [vmem:[%s478_s12 + $0x78] sm:$0xf]  ;;  %v255_v9 = vmax.bf16 %v253_v1, %v250_v0 }
  0x23   : > { %v155_v5 = vld [vmem:[%s478_s12 + $0x7c] sm:$0xf]  ;;  %v152_v7 = vld [vmem:[%s478_s12 + $0x70] sm:$0xf]  ;;  %v153_v8 = vld [vmem:[%s478_s12 + $0x74] sm:$0xf]  ;;  %v248_v11 = vmax.bf16 %v246_v3, %v243_v2 }
  0x24   : > { %304 = vrot.lane.b32.xlu1 %v554_v52, %s453_s13  ;;  %v264_v12 = vsel %vm156_vm0, %v154_v4, 4286644096  ;;  %v267_v13 = vsel %vm156_vm0, %v155_v5, 4286644096  ;;  %v257_v14 = vsel %vm156_vm0, %v152_v7, 4286644096 }
  0x25   : > { %302 = vrot.lane.b32.xlu0 %v559_v54, %s453_s13  ;;  %v260_v15 = vsel %vm156_vm0, %v153_v8, 4286644096  ;;  %v269_v16 = vmax.bf16 %v267_v13, %v264_v12 }
  0x26   : > { %v262_v18 = vmax.bf16 %v260_v15, %v257_v14 }
  0x28   : > { %308 = vrot.lane.b32.xlu1 %v570_v62, %s453_s13 }
  0x29   : > { %306 = vrot.lane.b32.xlu0 %v234_v63, %s453_s13 }
  0x2c   : > { %312 = vrot.lane.b32.xlu1 %v255_v9, %s453_s13 }
  0x2d   : > { %310 = vrot.lane.b32.xlu0 %v248_v11, %s453_s13 }
  0x30   : > { %316 = vrot.lane.b32.xlu1 %v269_v16, %s453_s13 }
  0x31   : > { %314 = vrot.lane.b32.xlu0 %v262_v18, %s453_s13 }
  0x86   : > { %v291_v19 = vpop.permute.xlu1 %290 }
  0x87   : > { %v336_v20 = vmax.bf16 %v291_v19, %v486_v6  ;;  %v287_v22 = vpop.permute.xlu0 %286 }
  0x88   : > { %v334_v23 = vmax.bf16 %v287_v22, %v491_v10 }
  0x89   : > { %353 = vst.msk [vmem:[%s597_s17 + $0x8] sm:$0xf] %vm350_vm1, %v336_v20 }
  0x8a   : > { %351 = vst.msk [vmem:[%s597_s17] sm:$0xf] %vm350_vm1, %v334_v23  ;;  %v293_v24 = vpop.permute.xlu1 %292 }
  0x8b   : > { %v337_v25 = vmax.bf16 %v293_v24, %v503_v17  ;;  %v289_v26 = vpop.permute.xlu0 %288 }
  0x8c   : > { %v335_v27 = vmax.bf16 %v289_v26, %v508_v21 }
  0x8d   : > { %354 = vst.msk [vmem:[%s597_s17 + $0xc] sm:$0xf] %vm350_vm1, %v337_v25 }
  0x8e   : > { %352 = vst.msk [vmem:[%s597_s17 + $0x4] sm:$0xf] %vm350_vm1, %v335_v27  ;;  %v297_v6 = vpop.permute.xlu1 %296 }
  0x8f   : > { %v339_v10 = vmax.bf16 %v297_v6, %v518_v28  ;;  %v295_v29 = vpop.permute.xlu0 %294 }
  0x90   : > { %v338_v30 = vmax.bf16 %v295_v29, %v525_v32 }
  0x91   : > { %356 = vst.msk [vmem:[%s597_s17 + $0x14] sm:$0xf] %vm350_vm1, %v339_v10 }
  0x92   : > { %355 = vst.msk [vmem:[%s597_s17 + $0x10] sm:$0xf] %vm350_vm1, %v338_v30  ;;  %v301_v17 = vpop.permute.xlu1 %300 }
  0x93   : > { %v341_v21 = vmax.bf16 %v301_v17, %v537_v41  ;;  %v299_v31 = vpop.permute.xlu0 %298 }
  0x94   : > { %v340_v33 = vmax.bf16 %v299_v31, %v543_v44 }
  0x95   : > { %358 = vst.msk [vmem:[%s597_s17 + $0x1c] sm:$0xf] %vm350_vm1, %v341_v21 }
  0x96   : > { %357 = vst.msk [vmem:[%s597_s17 + $0x18] sm:$0xf] %vm350_vm1, %v340_v33  ;;  %v305_v28 = vpop.permute.xlu1 %304 }
  0x97   : > { %v343_v32 = vmax.bf16 %v305_v28, %v554_v52  ;;  %v303_v34 = vpop.permute.xlu0 %302 }
  0x98   : > { %v342_v35 = vmax.bf16 %v303_v34, %v559_v54 }
  0x99   : > { %360 = vst.msk [vmem:[%s597_s17 + $0x24] sm:$0xf] %vm350_vm1, %v343_v32 }
  0x9a   : > { %359 = vst.msk [vmem:[%s597_s17 + $0x20] sm:$0xf] %vm350_vm1, %v342_v35  ;;  %v309_v36 = vpop.permute.xlu1 %308 }
  0x9b   : > { %v345_v37 = vmax.bf16 %v309_v36, %v570_v62  ;;  %v307_v38 = vpop.permute.xlu0 %306 }
  0x9c   : > { %v344_v39 = vmax.bf16 %v307_v38, %v234_v63 }
  0x9d   : > { %362 = vst.msk [vmem:[%s597_s17 + $0x2c] sm:$0xf] %vm350_vm1, %v345_v37 }
  0x9e   : > { %361 = vst.msk [vmem:[%s597_s17 + $0x28] sm:$0xf] %vm350_vm1, %v344_v39  ;;  %v313_v40 = vpop.permute.xlu1 %312 }
  0x9f   : > { %v347_v41 = vmax.bf16 %v313_v40, %v255_v9  ;;  %v311_v42 = vpop.permute.xlu0 %310 }
  0xa0   : > { %v346_v43 = vmax.bf16 %v311_v42, %v248_v11 }
  0xa1   : > { %364 = vst.msk [vmem:[%s597_s17 + $0x34] sm:$0xf] %vm350_vm1, %v347_v41 }
  0xa2   : > { %363 = vst.msk [vmem:[%s597_s17 + $0x30] sm:$0xf] %vm350_vm1, %v346_v43  ;;  %v317_v44 = vpop.permute.xlu1 %316 }
  0xa3   : > { %v349_v45 = vmax.bf16 %v317_v44, %v269_v16  ;;  %v315_v46 = vpop.permute.xlu0 %314 }
  0xa4   : > { %v348_v47 = vmax.bf16 %v315_v46, %v262_v18 }
  0xa5   : > { %366 = vst.msk [vmem:[%s597_s17 + $0x3c] sm:$0xf] %vm350_vm1, %v349_v45 }
  0xa6   : > { %365 = vst.msk [vmem:[%s597_s17 + $0x38] sm:$0xf] %vm350_vm1, %v348_v47 }
  0xa7 PF: > { %s11_s6 = sadd.s32 1, %s451_s6  }
  0xa8   : > { %p8_p4 = scmp.ge.s32.totalorder %s11_s6, 4  }
  0xaa   :  { %10 = sbr.rel (!%p8_p4) target bundleno = 1 (0x1), region = 54 }

// kernel: vgg_forward.13
= control target key start
LH: loop header
LB: loop body
LE: loop exit
PB: predicated region body
PF: predicated region fallthrough
CT: control target
= control target key end

     0   :  { %s1945_s12 = smov 0   ;;  %s1947_s13 = smov 0   ;;  %s2146_s0 = inlined_call_operand.vmem [shape: bf16[1024,128], index: 0, kind: input, shape index: {}]   ;;  %s2147_s1 = inlined_call_operand.vmem [shape: bf16[128,128], index: 1, kind: input, shape index: {}]   ;;  %s2148_s2 = inlined_call_operand.vmem [shape: f32[1,128], index: 2, kind: input, shape index: {}]   ;;  %s2149_s3 = inlined_call_operand.vmem [shape: bf16[1024,128], index: 3, kind: output, shape index: {}]  }
   0x1   :  { %s1949_s14 = smov 0  }
   0x2 LB: > { %s22_s15 = sadd.s32 1, %s1919_s13  ;;  %p1334_p0 = scmp.ge.s32.totalorder %s1923_s14, 1  ;;  %s1923_s14 = sphi %s1949_s14, %s13_s14   ;;  %s1919_s13 = sphi %s1947_s13, %s2151_s13   ;;  %s1915_s12 = sphi %s1945_s12, %s2150_s12  }
   0x3   : > { %p23_p1 = scmp.ge.s32.totalorder %s22_s15, 2  ;;  %p169_p2 = scmp.lt.s32.totalorder %s1923_s14, 3 }
   0x5   : > { %s2153_s15 = smov (%p23_p1, %s22_s15), 0  ;;  %p170_p3 = pnand %p1334_p0, %p169_p2 }
   0x6   : > { %v1861_v0 = vld [vmem:[%s2147_s1] sm:$0xff] (!%p170_p3)   ;;  %s1335_s18 = sshll.u32 (!%p170_p3), %s1915_s12, 6  ;;  %v1862_v1 = vld [vmem:[%s2147_s1 + $0x8] sm:$0xff] (!%p170_p3)   ;;  %v1863_v2 = vld [vmem:[%s2147_s1 + $0x10] sm:$0xff] (!%p170_p3)  }
   0x7   : > { %173 = sbr.rel (%p170_p3) target bundleno = 317 (0x13d), region = 32  ;;  %p204_p4 = scmp.lt.s32.totalorder (!%p170_p3), %s1335_s18, 127  ;;  %1741 = vmatprep.subr.bf16.mxu0 (!%p170_p3), %v1861_v0  ;;  %1821 = vmatprep.subr.bf16.mxu1 (!%p170_p3), %v1861_v0  ;;  %v1864_v3 = vld [vmem:[%s2147_s1 + $0x18] sm:$0xff] (!%p170_p3)   ;;  %v1865_v6 = vld [vmem:[%s2147_s1 + $0x20] sm:$0xff] (!%p170_p3)   ;;  %v1866_v7 = vld [vmem:[%s2147_s1 + $0x28] sm:$0xff] (!%p170_p3)  }
   0x8   : > { %1742 = vmatpush3.bf16.msra.mxu0 (!%p170_p3), %v1861_v0  ;;  %1829 = vmatpush3.bf16.msra.mxu1 (!%p170_p3), %v1861_v0  ;;  %v1867_v8 = vld [vmem:[%s2147_s1 + $0x30] sm:$0xff] (!%p170_p3)   ;;  %v1868_v9 = vld [vmem:[%s2147_s1 + $0x38] sm:$0xff] (!%p170_p3)   ;;  %v2032_v40 = vld [vmem:[%s2148_s2] ss:$0 sm:$0xff] (!%p170_p3) }
   0x9   : > { %1743 = vmatprep.subr.bf16.mxu0 (!%p170_p3), %v1862_v1  ;;  %1822 = vmatprep.subr.bf16.mxu1 (!%p170_p3), %v1862_v1 }
   0xc   : > { %1744 = vmatpush3.bf16.msra.mxu0 (!%p170_p3), %v1862_v1  ;;  %1830 = vmatpush3.bf16.msra.mxu1 (!%p170_p3), %v1862_v1 }
   0xd   : > { %1745 = vmatprep.subr.bf16.mxu0 (!%p170_p3), %v1863_v2  ;;  %1823 = vmatprep.subr.bf16.mxu1 (!%p170_p3), %v1863_v2 }
   0xe   : > { %s2155_s18 = smov (!%p204_p4, %s1335_s18), 127 }
   0xf   : > { %s1336_s23 = sshll.u32 %s2155_s18, 2 }
  0x10   : > { %s1980_s26 = scalar_lea.vmem %s2146_s0, %s1336_s23  ;;  %1746 = vmatpush3.bf16.msra.mxu0 %v1863_v2  ;;  %1831 = vmatpush3.bf16.msra.mxu1 %v1863_v2  ;;  %s2047_s17 = scalar_lea.vmem %s2149_s3, %s1336_s23 }
  0x11   : > { %v1869_v4 = vld [vmem:[%s1980_s26] sm:$0xff]   ;;  %1747 = vmatprep.subr.bf16.mxu0 %v1864_v3  ;;  %1824 = vmatprep.subr.bf16.mxu1 %v1864_v3  ;;  %v1871_v10 = vld [vmem:[%s1980_s26 + $0x8] sm:$0xff]   ;;  %v1873_v12 = vld [vmem:[%s1980_s26 + $0x10] sm:$0xff]  }
  0x12   : > { %v1870_v5 = vld [vmem:[%s1980_s26 + $0x80] sm:$0xff]   ;;  %1757 = vmatprep.mubr.bf16.mxu0 %v1869_v4  ;;  %v1872_v11 = vld [vmem:[%s1980_s26 + $0x88] sm:$0xff]   ;;  %v1874_v13 = vld [vmem:[%s1980_s26 + $0x90] sm:$0xff]  }
  0x13   : > { %1789 = vmatprep.mubr.bf16.mxu1 %v1870_v5  ;;  %v1875_v14 = vld [vmem:[%s1980_s26 + $0x18] sm:$0xff]   ;;  %v1877_v16 = vld [vmem:[%s1980_s26 + $0x20] sm:$0xff]   ;;  %v1879_v18 = vld [vmem:[%s1980_s26 + $0x28] sm:$0xff]  }
  0x14   : > { %1748 = vmatpush3.bf16.msra.mxu0 %v1864_v3  ;;  %1832 = vmatpush3.bf16.msra.mxu1 %v1864_v3  ;;  %v1876_v15 = vld [vmem:[%s1980_s26 + $0x98] sm:$0xff]   ;;  %v1878_v17 = vld [vmem:[%s1980_s26 + $0xa0] sm:$0xff]   ;;  %v1880_v19 = vld [vmem:[%s1980_s26 + $0xa8] sm:$0xff]  }
  0x15   : > { %1749 = vmatprep.subr.bf16.mxu0 %v1865_v6  ;;  %1825 = vmatprep.subr.bf16.mxu1 %v1865_v6  ;;  %v1881_v20 = vld [vmem:[%s1980_s26 + $0x30] sm:$0xff]   ;;  %v1883_v22 = vld [vmem:[%s1980_s26 + $0x38] sm:$0xff]   ;;  %v1885_v24 = vld [vmem:[%s1980_s26 + $0x40] sm:$0xff]  }
  0x16   : > { %v1882_v21 = vld [vmem:[%s1980_s26 + $0xb0] sm:$0xff]   ;;  %v1884_v23 = vld [vmem:[%s1980_s26 + $0xb8] sm:$0xff]   ;;  %v1886_v25 = vld [vmem:[%s1980_s26 + $0xc0] sm:$0xff]  }
  0x17   : > { %v1887_v26 = vld [vmem:[%s1980_s26 + $0x48] sm:$0xff]   ;;  %v1889_v28 = vld [vmem:[%s1980_s26 + $0x50] sm:$0xff]   ;;  %v1891_v30 = vld [vmem:[%s1980_s26 + $0x58] sm:$0xff]  }
  0x18   : > { %1750 = vmatpush3.bf16.msra.mxu0 %v1865_v6  ;;  %1833 = vmatpush3.bf16.msra.mxu1 %v1865_v6  ;;  %v1888_v27 = vld [vmem:[%s1980_s26 + $0xc8] sm:$0xff]   ;;  %v1890_v29 = vld [vmem:[%s1980_s26 + $0xd0] sm:$0xff]   ;;  %v1892_v31 = vld [vmem:[%s1980_s26 + $0xd8] sm:$0xff]  }
  0x19   : > { %1751 = vmatprep.subr.bf16.mxu0 %v1866_v7  ;;  %1826 = vmatprep.subr.bf16.mxu1 %v1866_v7  ;;  %v1893_v32 = vld [vmem:[%s1980_s26 + $0x60] sm:$0xff]   ;;  %v1895_v34 = vld [vmem:[%s1980_s26 + $0x68] sm:$0xff]   ;;  %v1897_v36 = vld [vmem:[%s1980_s26 + $0x70] sm:$0xff]  }
  0x1a   : > { %v1894_v33 = vld [vmem:[%s1980_s26 + $0xe0] sm:$0xff]   ;;  %v1896_v35 = vld [vmem:[%s1980_s26 + $0xe8] sm:$0xff]   ;;  %v1898_v37 = vld [vmem:[%s1980_s26 + $0xf0] sm:$0xff]  }
  0x1b   : > { %v1899_v38 = vld [vmem:[%s1980_s26 + $0x78] sm:$0xff]  }
  0x1c   : > { %1752 = vmatpush3.bf16.msra.mxu0 %v1866_v7  ;;  %1834 = vmatpush3.bf16.msra.mxu1 %v1866_v7  ;;  %v1900_v39 = vld [vmem:[%s1980_s26 + $0xf8] sm:$0xff]  }
  0x1d   : > { %1753 = vmatprep.subr.bf16.mxu0 %v1867_v8  ;;  %1827 = vmatprep.subr.bf16.mxu1 %v1867_v8 }
  0x20   : > { %1754 = vmatpush3.bf16.msra.mxu0 %v1867_v8  ;;  %1835 = vmatpush3.bf16.msra.mxu1 %v1867_v8 }
  0x21   : > { %1755 = vmatprep.subr.bf16.mxu0 %v1868_v9  ;;  %1828 = vmatprep.subr.bf16.mxu1 %v1868_v9 }
  0x24   : > { %1756 = vmatpush3.bf16.msra.mxu0 %v1868_v9  ;;  %1836 = vmatpush3.bf16.msra.mxu1 %v1868_v9 }
  0x27   : > { %1758 = vmatmul.mubr.bf16.vlgmr.msra.gmra.mrb[0].mxu0 %v1871_v10  ;;  %1790 = vmatmul.mubr.bf16.vlgmr.msra.gmra.mrb[0].mxu1 %v1872_v11 }
  0x28   : > { %1761 = vmatprep.mubr.bf16.mxu0 %v1873_v12  ;;  %1793 = vmatprep.mubr.bf16.mxu1 %v1874_v13 }
  0x2f   : > { %1762 = vmatmul.mubr.bf16.gmra.mrb[4].mxu0 %v1875_v14  ;;  %1794 = vmatmul.mubr.bf16.gmra.mrb[4].mxu1 %v1876_v15 }
  0x30   : > { %1765 = vmatprep.mubr.bf16.mxu0 %v1877_v16  ;;  %1797 = vmatprep.mubr.bf16.mxu1 %v1878_v17 }
  0x37   : > { %1766 = vmatmul.mubr.bf16.gmra.mrb[8].mxu0 %v1879_v18  ;;  %1798 = vmatmul.mubr.bf16.gmra.mrb[8].mxu1 %v1880_v19 }
  0x38   : > { %1769 = vmatprep.mubr.bf16.mxu0 %v1881_v20  ;;  %1801 = vmatprep.mubr.bf16.mxu1 %v1882_v21 }
  0x3f   : > { %1770 = vmatmul.mubr.bf16.gmra.mrb[12].mxu0 %v1883_v22  ;;  %1802 = vmatmul.mubr.bf16.gmra.mrb[12].mxu1 %v1884_v23 }
  0x40   : > { %1773 = vmatprep.mubr.bf16.mxu0 %v1885_v24  ;;  %1805 = vmatprep.mubr.bf16.mxu1 %v1886_v25 }
  0x47   : > { %1774 = vmatmul.mubr.bf16.gmra.mrb[16].mxu0 %v1887_v26  ;;  %1806 = vmatmul.mubr.bf16.gmra.mrb[16].mxu1 %v1888_v27 }
  0x48   : > { %1777 = vmatprep.mubr.bf16.mxu0 %v1889_v28  ;;  %1809 = vmatprep.mubr.bf16.mxu1 %v1890_v29 }
  0x4f   : > { %1778 = vmatmul.mubr.bf16.gmra.mrb[20].mxu0 %v1891_v30  ;;  %1810 = vmatmul.mubr.bf16.gmra.mrb[20].mxu1 %v1892_v31 }
  0x50   : > { %1781 = vmatprep.mubr.bf16.mxu0 %v1893_v32  ;;  %1813 = vmatprep.mubr.bf16.mxu1 %v1894_v33 }
  0x57   : > { %1782 = vmatmul.mubr.bf16.gmra.mrb[24].mxu0 %v1895_v34  ;;  %1814 = vmatmul.mubr.bf16.gmra.mrb[24].mxu1 %v1896_v35 }
  0x58   : > { %1785 = vmatprep.mubr.bf16.mxu0 %v1897_v36  ;;  %1817 = vmatprep.mubr.bf16.mxu1 %v1898_v37 }
  0x5f   : > { %1786 = vmatmul.mubr.bf16.gmra.mrb[28].mxu0 %v1899_v38  ;;  %1818 = vmatmul.mubr.bf16.gmra.mrb[28].mxu1 %v1900_v39 }
  0xfa   : > { %v1759_v41 = vpop.f32.mrb[0].mxu0  ;;  %v1791_v42 = vpop.f32.mrb[0].mxu1 }
  0xfb   : > { %v596_v43 = vadd.f32 %v1759_v41, %v2032_v40  ;;  %v724_v44 = vadd.f32 %v1791_v42, %v2032_v40  ;;  %v587_v45 = vpop.f32.mrb[1].mxu0  ;;  %v715_v46 = vpop.f32.mrb[1].mxu1 }
  0xfc   : > { %v588_v47 = vadd.f32 %v2032_v40, %v587_v45  ;;  %v716_v48 = vadd.f32 %v2032_v40, %v715_v46  ;;  %v1760_v49 = vpop.f32.mrb[2].mxu0  ;;  %v1792_v50 = vpop.f32.mrb[2].mxu1 }
  0xfd   : > { %v599_v51 = vadd.f32 %v1760_v49, %v2032_v40  ;;  %v727_v52 = vadd.f32 %v1792_v50, %v2032_v40  ;;  %v590_v53 = vpop.f32.mrb[3].mxu0  ;;  %v718_v54 = vpop.f32.mrb[3].mxu1  ;;  %v844_v57 = vmax.f32 %v596_v43, 0.0  ;;  %v876_v58 = vmax.f32 %v724_v44, 0.0 }
  0xfe   : > { %v591_v55 = vadd.f32 %v2032_v40, %v590_v53  ;;  %v719_v56 = vadd.f32 %v2032_v40, %v718_v54  ;;  %v842_v61 = vmax.f32 %v588_v47, 0.0  ;;  %v874_v62 = vmax.f32 %v716_v48, 0.0 }
  0xff   : > { %v845_v59 = vmax.f32 %v599_v51, 0.0  ;;  %v877_v60 = vmax.f32 %v727_v52, 0.0 }
 0x100   : > { %v843_v63 = vmax.f32 %v591_v55, 0.0  ;;  %v875_v0 = vmax.f32 %v719_v56, 0.0 }
 0x101   : > { %v1518_v1 = vpack.c.bf16 %v845_v59, %v844_v57  ;;  %v1598_v2 = vpack.c.bf16 %v877_v60, %v876_v58 }
 0x102   : > { %v1513_v3 = vpack.c.bf16 %v843_v63, %v842_v61  ;;  %v1593_v4 = vpack.c.bf16 %v875_v0, %v874_v62  ;;  %v1763_v5 = vpop.f32.mrb[4].mxu0  ;;  %v1795_v6 = vpop.f32.mrb[4].mxu1 }
 0x103   : > { %1670 = vst [vmem:[%s2047_s17 + $0x8] sm:$0xff] %v1518_v1   ;;  %1686 = vst [vmem:[%s2047_s17 + $0x88] sm:$0xff] %v1598_v2   ;;  %v612_v7 = vadd.f32 %v1763_v5, %v2032_v40  ;;  %v740_v8 = vadd.f32 %v1795_v6, %v2032_v40  ;;  %v603_v9 = vpop.f32.mrb[5].mxu0  ;;  %v731_v10 = vpop.f32.mrb[5].mxu1 }
 0x104   : > { %1514 = vst [vmem:[%s2047_s17] sm:$0xff] %v1513_v3   ;;  %1685 = vst [vmem:[%s2047_s17 + $0x80] sm:$0xff] %v1593_v4   ;;  %v604_v11 = vadd.f32 %v2032_v40, %v603_v9  ;;  %v732_v12 = vadd.f32 %v2032_v40, %v731_v10  ;;  %v1764_v13 = vpop.f32.mrb[6].mxu0  ;;  %v1796_v14 = vpop.f32.mrb[6].mxu1 }
 0x105   : > { %v615_v15 = vadd.f32 %v1764_v13, %v2032_v40  ;;  %v743_v16 = vadd.f32 %v1796_v14, %v2032_v40  ;;  %v606_v17 = vpop.f32.mrb[7].mxu0  ;;  %v734_v18 = vpop.f32.mrb[7].mxu1  ;;  %v848_v21 = vmax.f32 %v612_v7, 0.0  ;;  %v880_v22 = vmax.f32 %v740_v8, 0.0 }
 0x106   : > { %v607_v19 = vadd.f32 %v2032_v40, %v606_v17  ;;  %v735_v20 = vadd.f32 %v2032_v40, %v734_v18  ;;  %v846_v25 = vmax.f32 %v604_v11, 0.0  ;;  %v878_v26 = vmax.f32 %v732_v12, 0.0 }
 0x107   : > { %v849_v23 = vmax.f32 %v615_v15, 0.0  ;;  %v881_v24 = vmax.f32 %v743_v16, 0.0 }
 0x108   : > { %v847_v27 = vmax.f32 %v607_v19, 0.0  ;;  %v879_v28 = vmax.f32 %v735_v20, 0.0 }
 0x109   : > { %v1528_v29 = vpack.c.bf16 %v849_v23, %v848_v21  ;;  %v1608_v30 = vpack.c.bf16 %v881_v24, %v880_v22 }
 0x10a   : > { %v1523_v31 = vpack.c.bf16 %v847_v27, %v846_v25  ;;  %v1603_v32 = vpack.c.bf16 %v879_v28, %v878_v26  ;;  %v1767_v33 = vpop.f32.mrb[8].mxu0  ;;  %v1799_v34 = vpop.f32.mrb[8].mxu1 }
 0x10b   : > { %1672 = vst [vmem:[%s2047_s17 + $0x18] sm:$0xff] %v1528_v29   ;;  %1688 = vst [vmem:[%s2047_s17 + $0x98] sm:$0xff] %v1608_v30   ;;  %v628_v35 = vadd.f32 %v1767_v33, %v2032_v40  ;;  %v756_v36 = vadd.f32 %v1799_v34, %v2032_v40  ;;  %v619_v37 = vpop.f32.mrb[9].mxu0  ;;  %v747_v38 = vpop.f32.mrb[9].mxu1 }
 0x10c   : > { %1671 = vst [vmem:[%s2047_s17 + $0x10] sm:$0xff] %v1523_v31   ;;  %1687 = vst [vmem:[%s2047_s17 + $0x90] sm:$0xff] %v1603_v32   ;;  %v620_v39 = vadd.f32 %v2032_v40, %v619_v37  ;;  %v748_v41 = vadd.f32 %v2032_v40, %v747_v38  ;;  %v1768_v42 = vpop.f32.mrb[10].mxu0  ;;  %v1800_v43 = vpop.f32.mrb[10].mxu1 }
 0x10d   : > { %v631_v44 = vadd.f32 %v1768_v42, %v2032_v40  ;;  %v759_v45 = vadd.f32 %v1800_v43, %v2032_v40  ;;  %v622_v46 = vpop.f32.mrb[11].mxu0  ;;  %v750_v47 = vpop.f32.mrb[11].mxu1  ;;  %v852_v50 = vmax.f32 %v628_v35, 0.0  ;;  %v884_v51 = vmax.f32 %v756_v36, 0.0 }
 0x10e   : > { %v623_v48 = vadd.f32 %v2032_v40, %v622_v46  ;;  %v751_v49 = vadd.f32 %v2032_v40, %v750_v47  ;;  %v850_v54 = vmax.f32 %v620_v39, 0.0  ;;  %v882_v55 = vmax.f32 %v748_v41, 0.0 }
 0x10f   : > { %v853_v52 = vmax.f32 %v631_v44, 0.0  ;;  %v885_v53 = vmax.f32 %v759_v45, 0.0 }
 0x110   : > { %v851_v56 = vmax.f32 %v623_v48, 0.0  ;;  %v883_v57 = vmax.f32 %v751_v49, 0.0 }
 0x111   : > { %v1538_v58 = vpack.c.bf16 %v853_v52, %v852_v50  ;;  %v1618_v59 = vpack.c.bf16 %v885_v53, %v884_v51 }
 0x112   : > { %v1533_v60 = vpack.c.bf16 %v851_v56, %v850_v54  ;;  %v1613_v61 = vpack.c.bf16 %v883_v57, %v882_v55  ;;  %v1771_v62 = vpop.f32.mrb[12].mxu0  ;;  %v1803_v63 = vpop.f32.mrb[12].mxu1 }
 0x113   : > { %1674 = vst [vmem:[%s2047_s17 + $0x28] sm:$0xff] %v1538_v58   ;;  %1690 = vst [vmem:[%s2047_s17 + $0xa8] sm:$0xff] %v1618_v59   ;;  %v644_v0 = vadd.f32 %v1771_v62, %v2032_v40  ;;  %v772_v1 = vadd.f32 %v1803_v63, %v2032_v40  ;;  %v635_v2 = vpop.f32.mrb[13].mxu0  ;;  %v763_v3 = vpop.f32.mrb[13].mxu1 }
 0x114   : > { %1673 = vst [vmem:[%s2047_s17 + $0x20] sm:$0xff] %v1533_v60   ;;  %1689 = vst [vmem:[%s2047_s17 + $0xa0] sm:$0xff] %v1613_v61   ;;  %v636_v4 = vadd.f32 %v2032_v40, %v635_v2  ;;  %v764_v5 = vadd.f32 %v2032_v40, %v763_v3  ;;  %v1772_v6 = vpop.f32.mrb[14].mxu0  ;;  %v1804_v7 = vpop.f32.mrb[14].mxu1 }
 0x115   : > { %v647_v8 = vadd.f32 %v1772_v6, %v2032_v40  ;;  %v775_v9 = vadd.f32 %v1804_v7, %v2032_v40  ;;  %v638_v10 = vpop.f32.mrb[15].mxu0  ;;  %v766_v11 = vpop.f32.mrb[15].mxu1  ;;  %v856_v14 = vmax.f32 %v644_v0, 0.0  ;;  %v888_v15 = vmax.f32 %v772_v1, 0.0 }
 0x116   : > { %v639_v12 = vadd.f32 %v2032_v40, %v638_v10  ;;  %v767_v13 = vadd.f32 %v2032_v40, %v766_v11  ;;  %v854_v18 = vmax.f32 %v636_v4, 0.0  ;;  %v886_v19 = vmax.f32 %v764_v5, 0.0 }
 0x117   : > { %v857_v16 = vmax.f32 %v647_v8, 0.0  ;;  %v889_v17 = vmax.f32 %v775_v9, 0.0 }
 0x118   : > { %v855_v20 = vmax.f32 %v639_v12, 0.0  ;;  %v887_v21 = vmax.f32 %v767_v13, 0.0 }
 0x119   : > { %v1548_v22 = vpack.c.bf16 %v857_v16, %v856_v14  ;;  %v1628_v23 = vpack.c.bf16 %v889_v17, %v888_v15 }
 0x11a   : > { %v1543_v24 = vpack.c.bf16 %v855_v20, %v854_v18  ;;  %v1623_v25 = vpack.c.bf16 %v887_v21, %v886_v19  ;;  %v1775_v26 = vpop.f32.mrb[16].mxu0  ;;  %v1807_v27 = vpop.f32.mrb[16].mxu1 }
 0x11b   : > { %1676 = vst [vmem:[%s2047_s17 + $0x38] sm:$0xff] %v1548_v22   ;;  %1692 = vst [vmem:[%s2047_s17 + $0xb8] sm:$0xff] %v1628_v23   ;;  %v660_v28 = vadd.f32 %v1775_v26, %v2032_v40  ;;  %v788_v29 = vadd.f32 %v1807_v27, %v2032_v40  ;;  %v651_v30 = vpop.f32.mrb[17].mxu0  ;;  %v779_v31 = vpop.f32.mrb[17].mxu1 }
 0x11c   : > { %1675 = vst [vmem:[%s2047_s17 + $0x30] sm:$0xff] %v1543_v24   ;;  %1691 = vst [vmem:[%s2047_s17 + $0xb0] sm:$0xff] %v1623_v25   ;;  %v652_v32 = vadd.f32 %v2032_v40, %v651_v30  ;;  %v780_v33 = vadd.f32 %v2032_v40, %v779_v31  ;;  %v1776_v34 = vpop.f32.mrb[18].mxu0  ;;  %v1808_v35 = vpop.f32.mrb[18].mxu1 }
 0x11d   : > { %v663_v36 = vadd.f32 %v1776_v34, %v2032_v40  ;;  %v791_v37 = vadd.f32 %v1808_v35, %v2032_v40  ;;  %v654_v38 = vpop.f32.mrb[19].mxu0  ;;  %v782_v39 = vpop.f32.mrb[19].mxu1  ;;  %v860_v43 = vmax.f32 %v660_v28, 0.0  ;;  %v892_v44 = vmax.f32 %v788_v29, 0.0 }
 0x11e   : > { %v655_v41 = vadd.f32 %v2032_v40, %v654_v38  ;;  %v783_v42 = vadd.f32 %v2032_v40, %v782_v39  ;;  %v858_v47 = vmax.f32 %v652_v32, 0.0  ;;  %v890_v48 = vmax.f32 %v780_v33, 0.0 }
 0x11f   : > { %v861_v45 = vmax.f32 %v663_v36, 0.0  ;;  %v893_v46 = vmax.f32 %v791_v37, 0.0 }
 0x120   : > { %v859_v49 = vmax.f32 %v655_v41, 0.0  ;;  %v891_v50 = vmax.f32 %v783_v42, 0.0 }
 0x121   : > { %v1558_v51 = vpack.c.bf16 %v861_v45, %v860_v43  ;;  %v1638_v52 = vpack.c.bf16 %v893_v46, %v892_v44 }
 0x122   : > { %v1553_v53 = vpack.c.bf16 %v859_v49, %v858_v47  ;;  %v1633_v54 = vpack.c.bf16 %v891_v50, %v890_v48  ;;  %v1779_v55 = vpop.f32.mrb[20].mxu0  ;;  %v1811_v56 = vpop.f32.mrb[20].mxu1 }
 0x123   : > { %1678 = vst [vmem:[%s2047_s17 + $0x48] sm:$0xff] %v1558_v51   ;;  %1694 = vst [vmem:[%s2047_s17 + $0xc8] sm:$0xff] %v1638_v52   ;;  %v676_v57 = vadd.f32 %v1779_v55, %v2032_v40  ;;  %v804_v58 = vadd.f32 %v1811_v56, %v2032_v40  ;;  %v667_v59 = vpop.f32.mrb[21].mxu0  ;;  %v795_v60 = vpop.f32.mrb[21].mxu1 }
 0x124   : > { %1677 = vst [vmem:[%s2047_s17 + $0x40] sm:$0xff] %v1553_v53   ;;  %1693 = vst [vmem:[%s2047_s17 + $0xc0] sm:$0xff] %v1633_v54   ;;  %v668_v61 = vadd.f32 %v2032_v40, %v667_v59  ;;  %v796_v62 = vadd.f32 %v2032_v40, %v795_v60  ;;  %v1780_v63 = vpop.f32.mrb[22].mxu0  ;;  %v1812_v0 = vpop.f32.mrb[22].mxu1 }
 0x125   : > { %v679_v1 = vadd.f32 %v1780_v63, %v2032_v40  ;;  %v807_v2 = vadd.f32 %v1812_v0, %v2032_v40  ;;  %v670_v3 = vpop.f32.mrb[23].mxu0  ;;  %v798_v4 = vpop.f32.mrb[23].mxu1  ;;  %v864_v7 = vmax.f32 %v676_v57, 0.0  ;;  %v896_v8 = vmax.f32 %v804_v58, 0.0 }
 0x126   : > { %v671_v5 = vadd.f32 %v2032_v40, %v670_v3  ;;  %v799_v6 = vadd.f32 %v2032_v40, %v798_v4  ;;  %v862_v11 = vmax.f32 %v668_v61, 0.0  ;;  %v894_v12 = vmax.f32 %v796_v62, 0.0 }
 0x127   : > { %v865_v9 = vmax.f32 %v679_v1, 0.0  ;;  %v897_v10 = vmax.f32 %v807_v2, 0.0 }
 0x128   : > { %v863_v13 = vmax.f32 %v671_v5, 0.0  ;;  %v895_v14 = vmax.f32 %v799_v6, 0.0 }
 0x129   : > { %v1568_v15 = vpack.c.bf16 %v865_v9, %v864_v7  ;;  %v1648_v16 = vpack.c.bf16 %v897_v10, %v896_v8 }
 0x12a   : > { %v1563_v17 = vpack.c.bf16 %v863_v13, %v862_v11  ;;  %v1643_v18 = vpack.c.bf16 %v895_v14, %v894_v12  ;;  %v1783_v19 = vpop.f32.mrb[24].mxu0  ;;  %v1815_v20 = vpop.f32.mrb[24].mxu1 }
 0x12b   : > { %1680 = vst [vmem:[%s2047_s17 + $0x58] sm:$0xff] %v1568_v15   ;;  %1696 = vst [vmem:[%s2047_s17 + $0xd8] sm:$0xff] %v1648_v16   ;;  %v692_v21 = vadd.f32 %v1783_v19, %v2032_v40  ;;  %v820_v22 = vadd.f32 %v1815_v20, %v2032_v40  ;;  %v683_v23 = vpop.f32.mrb[25].mxu0  ;;  %v811_v24 = vpop.f32.mrb[25].mxu1 }
 0x12c   : > { %1679 = vst [vmem:[%s2047_s17 + $0x50] sm:$0xff] %v1563_v17   ;;  %1695 = vst [vmem:[%s2047_s17 + $0xd0] sm:$0xff] %v1643_v18   ;;  %v684_v25 = vadd.f32 %v2032_v40, %v683_v23  ;;  %v812_v26 = vadd.f32 %v2032_v40, %v811_v24  ;;  %v1784_v27 = vpop.f32.mrb[26].mxu0  ;;  %v1816_v28 = vpop.f32.mrb[26].mxu1 }
 0x12d   : > { %v695_v29 = vadd.f32 %v1784_v27, %v2032_v40  ;;  %v823_v30 = vadd.f32 %v1816_v28, %v2032_v40  ;;  %v686_v31 = vpop.f32.mrb[27].mxu0  ;;  %v814_v32 = vpop.f32.mrb[27].mxu1  ;;  %v868_v35 = vmax.f32 %v692_v21, 0.0  ;;  %v900_v36 = vmax.f32 %v820_v22, 0.0 }
 0x12e   : > { %v687_v33 = vadd.f32 %v2032_v40, %v686_v31  ;;  %v815_v34 = vadd.f32 %v2032_v40, %v814_v32  ;;  %v866_v39 = vmax.f32 %v684_v25, 0.0  ;;  %v898_v41 = vmax.f32 %v812_v26, 0.0 }
 0x12f   : > { %v869_v37 = vmax.f32 %v695_v29, 0.0  ;;  %v901_v38 = vmax.f32 %v823_v30, 0.0 }
 0x130   : > { %v867_v42 = vmax.f32 %v687_v33, 0.0  ;;  %v899_v43 = vmax.f32 %v815_v34, 0.0 }
 0x131   : > { %v1578_v44 = vpack.c.bf16 %v869_v37, %v868_v35  ;;  %v1658_v45 = vpack.c.bf16 %v901_v38, %v900_v36 }
 0x132   : > { %v1573_v46 = vpack.c.bf16 %v867_v42, %v866_v39  ;;  %v1653_v47 = vpack.c.bf16 %v899_v43, %v898_v41  ;;  %v1787_v48 = vpop.f32.mrb[28].mxu0  ;;  %v1819_v49 = vpop.f32.mrb[28].mxu1 }
 0x133   : > { %1682 = vst [vmem:[%s2047_s17 + $0x68] sm:$0xff] %v1578_v44   ;;  %1698 = vst [vmem:[%s2047_s17 + $0xe8] sm:$0xff] %v1658_v45   ;;  %v708_v50 = vadd.f32 %v1787_v48, %v2032_v40  ;;  %v836_v51 = vadd.f32 %v1819_v49, %v2032_v40  ;;  %v699_v52 = vpop.f32.mrb[29].mxu0  ;;  %v827_v53 = vpop.f32.mrb[29].mxu1 }
 0x134   : > { %1681 = vst [vmem:[%s2047_s17 + $0x60] sm:$0xff] %v1573_v46   ;;  %1697 = vst [vmem:[%s2047_s17 + $0xe0] sm:$0xff] %v1653_v47   ;;  %v700_v54 = vadd.f32 %v2032_v40, %v699_v52  ;;  %v828_v55 = vadd.f32 %v2032_v40, %v827_v53  ;;  %v1788_v56 = vpop.f32.mrb[30].mxu0  ;;  %v1820_v57 = vpop.f32.mrb[30].mxu1 }
 0x135   : > { %v711_v58 = vadd.f32 %v1788_v56, %v2032_v40  ;;  %v839_v59 = vadd.f32 %v1820_v57, %v2032_v40  ;;  %v702_v60 = vpop.f32.mrb[31].mxu0  ;;  %v830_v61 = vpop.f32.mrb[31].mxu1  ;;  %v872_v0 = vmax.f32 %v708_v50, 0.0  ;;  %v904_v1 = vmax.f32 %v836_v51, 0.0 }
 0x136   : > { %v703_v62 = vadd.f32 %v2032_v40, %v702_v60  ;;  %v831_v63 = vadd.f32 %v2032_v40, %v830_v61  ;;  %v870_v4 = vmax.f32 %v700_v54, 0.0  ;;  %v902_v5 = vmax.f32 %v828_v55, 0.0 }
 0x137   : > { %v873_v2 = vmax.f32 %v711_v58, 0.0  ;;  %v905_v3 = vmax.f32 %v839_v59, 0.0 }
 0x138   : > { %v871_v6 = vmax.f32 %v703_v62, 0.0  ;;  %v903_v7 = vmax.f32 %v831_v63, 0.0 }
 0x139   : > { %v1588_v8 = vpack.c.bf16 %v873_v2, %v872_v0  ;;  %v1668_v9 = vpack.c.bf16 %v905_v3, %v904_v1 }
 0x13a   : > { %v1583_v10 = vpack.c.bf16 %v871_v6, %v870_v4  ;;  %v1663_v11 = vpack.c.bf16 %v903_v7, %v902_v5 }
 0x13b   : > { %1684 = vst [vmem:[%s2047_s17 + $0x78] sm:$0xff] %v1588_v8   ;;  %1700 = vst [vmem:[%s2047_s17 + $0xf8] sm:$0xff] %v1668_v9  }
 0x13c   : > { %1683 = vst [vmem:[%s2047_s17 + $0x70] sm:$0xff] %v1583_v10   ;;  %1699 = vst [vmem:[%s2047_s17 + $0xf0] sm:$0xff] %v1663_v11  }
 0x13d PF: > { %s13_s14 = sadd.s32 1, %s1923_s14   ;;  %s2150_s12 = smov %s1919_s13 }
 0x13e   : > { %p10_p5 = scmp.ge.s32.totalorder %s13_s14, 4   ;;  %s2151_s13 = smov %s2153_s15 }
 0x140   :  { %12 = sbr.rel (!%p10_p5) target bundleno = 2 (0x2), region = 68 }

// kernel: vgg_forward.15
= control target key start
LH: loop header
LB: loop body
LE: loop exit
PB: predicated region body
PF: predicated region fallthrough
CT: control target
= control target key end

     0   :  { %s913_s12 = smov 0   ;;  %s915_s13 = smov 0   ;;  %s1000_s0 = inlined_call_operand.vmem [shape: bf16[256,128], index: 0, kind: input, shape index: {}]   ;;  %s1001_s1 = inlined_call_operand.vmem [shape: bf16[128,128], index: 1, kind: input, shape index: {}]   ;;  %s1002_s2 = inlined_call_operand.vmem [shape: f32[1,128], index: 2, kind: input, shape index: {}]   ;;  %s1003_s3 = inlined_call_operand.vmem [shape: bf16[256,128], index: 3, kind: output, shape index: {}]  }
   0x1   :  { %s917_s14 = smov 0  }
   0x2 LB: > { %s22_s15 = sadd.s32 1, %s887_s13  ;;  %p662_p0 = scmp.ge.s32.totalorder %s891_s14, 1  ;;  %s891_s14 = sphi %s917_s14, %s13_s14   ;;  %s887_s13 = sphi %s915_s13, %s1005_s13   ;;  %s883_s12 = sphi %s913_s12, %s1004_s12  }
   0x3   : > { %p23_p1 = scmp.ge.s32.totalorder %s22_s15, 2  ;;  %p169_p2 = scmp.lt.s32.totalorder %s891_s14, 3 }
   0x5   : > { %s1007_s15 = smov (%p23_p1, %s22_s15), 0  ;;  %p170_p3 = pnand %p662_p0, %p169_p2 }
   0x6   : > { %v853_v0 = vld [vmem:[%s1001_s1] sm:$0xff] (!%p170_p3)   ;;  %s663_s18 = sshll.u32 (!%p170_p3), %s883_s12, 4  ;;  %v854_v1 = vld [vmem:[%s1001_s1 + $0x8] sm:$0xff] (!%p170_p3)   ;;  %v855_v2 = vld [vmem:[%s1001_s1 + $0x10] sm:$0xff] (!%p170_p3)  }
   0x7   : > { %173 = sbr.rel (%p170_p3) target bundleno = 269 (0x10d), region = 32  ;;  %p204_p4 = scmp.lt.s32.totalorder (!%p170_p3), %s663_s18, 31  ;;  %781 = vmatprep.subr.bf16.mxu0 (!%p170_p3), %v853_v0  ;;  %813 = vmatprep.subr.bf16.mxu1 (!%p170_p3), %v853_v0  ;;  %v856_v3 = vld [vmem:[%s1001_s1 + $0x18] sm:$0xff] (!%p170_p3)   ;;  %v857_v6 = vld [vmem:[%s1001_s1 + $0x20] sm:$0xff] (!%p170_p3)   ;;  %v858_v7 = vld [vmem:[%s1001_s1 + $0x28] sm:$0xff] (!%p170_p3)  }
   0x8   : > { %782 = vmatpush3.bf16.msra.mxu0 (!%p170_p3), %v853_v0  ;;  %821 = vmatpush3.bf16.msra.mxu1 (!%p170_p3), %v853_v0  ;;  %v859_v8 = vld [vmem:[%s1001_s1 + $0x30] sm:$0xff] (!%p170_p3)   ;;  %v860_v9 = vld [vmem:[%s1001_s1 + $0x38] sm:$0xff] (!%p170_p3)   ;;  %v667_v16 = vld [vmem:[%s1002_s2] ss:$0 sm:$0xff] (!%p170_p3) }
   0x9   : > { %783 = vmatprep.subr.bf16.mxu0 (!%p170_p3), %v854_v1  ;;  %814 = vmatprep.subr.bf16.mxu1 (!%p170_p3), %v854_v1 }
   0xc   : > { %784 = vmatpush3.bf16.msra.mxu0 (!%p170_p3), %v854_v1  ;;  %822 = vmatpush3.bf16.msra.mxu1 (!%p170_p3), %v854_v1 }
   0xd   : > { %785 = vmatprep.subr.bf16.mxu0 (!%p170_p3), %v855_v2  ;;  %815 = vmatprep.subr.bf16.mxu1 (!%p170_p3), %v855_v2 }
   0xe   : > { %s1009_s18 = smov (!%p204_p4, %s663_s18), 31 }
   0xf   : > { %s664_s23 = sshll.u32 %s1009_s18, 2 }
  0x10   : > { %s948_s26 = scalar_lea.vmem %s1000_s0, %s664_s23  ;;  %786 = vmatpush3.bf16.msra.mxu0 %v855_v2  ;;  %823 = vmatpush3.bf16.msra.mxu1 %v855_v2  ;;  %s981_s17 = scalar_lea.vmem %s1003_s3, %s664_s23 }
  0x11   : > { %v861_v4 = vld [vmem:[%s948_s26] sm:$0xff]   ;;  %787 = vmatprep.subr.bf16.mxu0 %v856_v3  ;;  %816 = vmatprep.subr.bf16.mxu1 %v856_v3  ;;  %v863_v10 = vld [vmem:[%s948_s26 + $0x8] sm:$0xff]   ;;  %v865_v12 = vld [vmem:[%s948_s26 + $0x10] sm:$0xff]  }
  0x12   : > { %v862_v5 = vld [vmem:[%s948_s26 + $0x20] sm:$0xff]   ;;  %797 = vmatprep.mubr.bf16.mxu0 %v861_v4  ;;  %v864_v11 = vld [vmem:[%s948_s26 + $0x28] sm:$0xff]   ;;  %v866_v13 = vld [vmem:[%s948_s26 + $0x30] sm:$0xff]  }
  0x13   : > { %805 = vmatprep.mubr.bf16.mxu1 %v862_v5  ;;  %v867_v14 = vld [vmem:[%s948_s26 + $0x18] sm:$0xff]  }
  0x14   : > { %788 = vmatpush3.bf16.msra.mxu0 %v856_v3  ;;  %824 = vmatpush3.bf16.msra.mxu1 %v856_v3  ;;  %v868_v15 = vld [vmem:[%s948_s26 + $0x38] sm:$0xff]  }
  0x15   : > { %789 = vmatprep.subr.bf16.mxu0 %v857_v6  ;;  %817 = vmatprep.subr.bf16.mxu1 %v857_v6 }
  0x18   : > { %790 = vmatpush3.bf16.msra.mxu0 %v857_v6  ;;  %825 = vmatpush3.bf16.msra.mxu1 %v857_v6 }
  0x19   : > { %791 = vmatprep.subr.bf16.mxu0 %v858_v7  ;;  %818 = vmatprep.subr.bf16.mxu1 %v858_v7 }
  0x1c   : > { %792 = vmatpush3.bf16.msra.mxu0 %v858_v7  ;;  %826 = vmatpush3.bf16.msra.mxu1 %v858_v7 }
  0x1d   : > { %793 = vmatprep.subr.bf16.mxu0 %v859_v8  ;;  %819 = vmatprep.subr.bf16.mxu1 %v859_v8 }
  0x20   : > { %794 = vmatpush3.bf16.msra.mxu0 %v859_v8  ;;  %827 = vmatpush3.bf16.msra.mxu1 %v859_v8 }
  0x21   : > { %795 = vmatprep.subr.bf16.mxu0 %v860_v9  ;;  %820 = vmatprep.subr.bf16.mxu1 %v860_v9 }
  0x24   : > { %796 = vmatpush3.bf16.msra.mxu0 %v860_v9  ;;  %828 = vmatpush3.bf16.msra.mxu1 %v860_v9 }
  0x27   : > { %798 = vmatmul.mubr.bf16.vlgmr.msra.gmra.mrb[0].mxu0 %v863_v10  ;;  %806 = vmatmul.mubr.bf16.vlgmr.msra.gmra.mrb[0].mxu1 %v864_v11 }
  0x28   : > { %801 = vmatprep.mubr.bf16.mxu0 %v865_v12  ;;  %809 = vmatprep.mubr.bf16.mxu1 %v866_v13 }
  0x2f   : > { %802 = vmatmul.mubr.bf16.gmra.mrb[4].mxu0 %v867_v14  ;;  %810 = vmatmul.mubr.bf16.gmra.mrb[4].mxu1 %v868_v15 }
  0xfa   : > { %v799_v17 = vpop.f32.mrb[0].mxu0  ;;  %v807_v18 = vpop.f32.mrb[0].mxu1 }
  0xfb   : > { %v404_v19 = vadd.f32 %v799_v17, %v667_v16  ;;  %v436_v20 = vadd.f32 %v807_v18, %v667_v16  ;;  %v395_v21 = vpop.f32.mrb[1].mxu0  ;;  %v427_v22 = vpop.f32.mrb[1].mxu1 }
  0xfc   : > { %v396_v23 = vadd.f32 %v667_v16, %v395_v21  ;;  %v428_v24 = vadd.f32 %v667_v16, %v427_v22  ;;  %v800_v25 = vpop.f32.mrb[2].mxu0  ;;  %v808_v26 = vpop.f32.mrb[2].mxu1 }
  0xfd   : > { %v407_v27 = vadd.f32 %v800_v25, %v667_v16  ;;  %v439_v28 = vadd.f32 %v808_v26, %v667_v16  ;;  %v398_v29 = vpop.f32.mrb[3].mxu0  ;;  %v430_v30 = vpop.f32.mrb[3].mxu1  ;;  %v460_v33 = vmax.f32 %v404_v19, 0.0  ;;  %v468_v34 = vmax.f32 %v436_v20, 0.0 }
  0xfe   : > { %v399_v31 = vadd.f32 %v667_v16, %v398_v29  ;;  %v431_v32 = vadd.f32 %v667_v16, %v430_v30  ;;  %v458_v37 = vmax.f32 %v396_v23, 0.0  ;;  %v466_v38 = vmax.f32 %v428_v24, 0.0 }
  0xff   : > { %v461_v35 = vmax.f32 %v407_v27, 0.0  ;;  %v469_v36 = vmax.f32 %v439_v28, 0.0 }
 0x100   : > { %v459_v39 = vmax.f32 %v399_v31, 0.0  ;;  %v467_v40 = vmax.f32 %v431_v32, 0.0 }
 0x101   : > { %v726_v41 = vpack.c.bf16 %v461_v35, %v460_v33  ;;  %v746_v42 = vpack.c.bf16 %v469_v36, %v468_v34 }
 0x102   : > { %v721_v43 = vpack.c.bf16 %v459_v39, %v458_v37  ;;  %v741_v44 = vpack.c.bf16 %v467_v40, %v466_v38  ;;  %v803_v45 = vpop.f32.mrb[4].mxu0  ;;  %v811_v46 = vpop.f32.mrb[4].mxu1 }
 0x103   : > { %758 = vst [vmem:[%s981_s17 + $0x8] sm:$0xff] %v726_v41   ;;  %762 = vst [vmem:[%s981_s17 + $0x28] sm:$0xff] %v746_v42   ;;  %v420_v47 = vadd.f32 %v803_v45, %v667_v16  ;;  %v452_v48 = vadd.f32 %v811_v46, %v667_v16  ;;  %v411_v49 = vpop.f32.mrb[5].mxu0  ;;  %v443_v50 = vpop.f32.mrb[5].mxu1 }
 0x104   : > { %722 = vst [vmem:[%s981_s17] sm:$0xff] %v721_v43   ;;  %761 = vst [vmem:[%s981_s17 + $0x20] sm:$0xff] %v741_v44   ;;  %v412_v51 = vadd.f32 %v667_v16, %v411_v49  ;;  %v444_v52 = vadd.f32 %v667_v16, %v443_v50  ;;  %v804_v53 = vpop.f32.mrb[6].mxu0  ;;  %v812_v54 = vpop.f32.mrb[6].mxu1 }
 0x105   : > { %v423_v55 = vadd.f32 %v804_v53, %v667_v16  ;;  %v455_v56 = vadd.f32 %v812_v54, %v667_v16  ;;  %v414_v57 = vpop.f32.mrb[7].mxu0  ;;  %v446_v58 = vpop.f32.mrb[7].mxu1  ;;  %v464_v61 = vmax.f32 %v420_v47, 0.0  ;;  %v472_v62 = vmax.f32 %v452_v48, 0.0 }
 0x106   : > { %v415_v59 = vadd.f32 %v667_v16, %v414_v57  ;;  %v447_v60 = vadd.f32 %v667_v16, %v446_v58  ;;  %v462_v1 = vmax.f32 %v412_v51, 0.0  ;;  %v470_v2 = vmax.f32 %v444_v52, 0.0 }
 0x107   : > { %v465_v63 = vmax.f32 %v423_v55, 0.0  ;;  %v473_v0 = vmax.f32 %v455_v56, 0.0 }
 0x108   : > { %v463_v3 = vmax.f32 %v415_v59, 0.0  ;;  %v471_v4 = vmax.f32 %v447_v60, 0.0 }
 0x109   : > { %v736_v5 = vpack.c.bf16 %v465_v63, %v464_v61  ;;  %v756_v6 = vpack.c.bf16 %v473_v0, %v472_v62 }
 0x10a   : > { %v731_v7 = vpack.c.bf16 %v463_v3, %v462_v1  ;;  %v751_v8 = vpack.c.bf16 %v471_v4, %v470_v2 }
 0x10b   : > { %760 = vst [vmem:[%s981_s17 + $0x18] sm:$0xff] %v736_v5   ;;  %764 = vst [vmem:[%s981_s17 + $0x38] sm:$0xff] %v756_v6  }
 0x10c   : > { %759 = vst [vmem:[%s981_s17 + $0x10] sm:$0xff] %v731_v7   ;;  %763 = vst [vmem:[%s981_s17 + $0x30] sm:$0xff] %v751_v8  }
 0x10d PF: > { %s13_s14 = sadd.s32 1, %s891_s14   ;;  %s1004_s12 = smov %s887_s13 }
 0x10e   : > { %p10_p5 = scmp.ge.s32.totalorder %s13_s14, 4   ;;  %s1005_s13 = smov %s1007_s15 }
 0x110   :  { %12 = sbr.rel (!%p10_p5) target bundleno = 2 (0x2), region = 68 }

// kernel: vgg_forward.16
= control target key start
LH: loop header
LB: loop body
LE: loop exit
PB: predicated region body
PF: predicated region fallthrough
CT: control target
= control target key end

     0   :  { %s344_s6 = smov 0   ;;  %s415_s0 = inlined_call_operand.vmem [shape: bf16[16,2,4,16], index: 0, kind: input, shape index: {}]   ;;  %s416_s1 = inlined_call_operand.vmem [shape: bf16[16,4,8], index: 1, kind: output, shape index: {}]  }
   0x1 LB: > { %s303_s7 = sadd.s32 4294967295, %s331_s6   ;;  %p307_p0 = scmp.ge.s32.totalorder %s331_s6, 1  ;;  %s331_s6 = sphi %s344_s6, %s11_s6  }
   0x2   : > { %p89_p1 = scmp.lt.s32.totalorder %s331_s6, 3 }
   0x4   : > { %p90_p2 = pnand %p307_p0, %p89_p1 }
   0x5   : > { %s308_s8 = sshll.u32 (!%p90_p2), %s303_s7, 3  ;;  %vm140_vm0 = vcmask (!%p90_p2), 123904   ;;  %s333_s13 = smov (!%p90_p2), 120   ;;  %vm238_vm1 = vcmask (!%p90_p2), 58368  }
   0x6   : > { %93 = sbr.rel (%p90_p2) target bundleno = 151 (0x97), region = 24  ;;  %p111_p3 = scmp.lt.s32.totalorder (!%p90_p2), %s308_s8, 15 }
   0xd   : > { %s418_s8 = smov (!%p111_p3, %s308_s8), 15 }
   0xe   : > { %s315_s9 = sshll.u32 %s418_s8, 2  ;;  %s312_s14 = sshll.u32 %s418_s8, 1 }
   0xf   : > { %s358_s12 = scalar_lea.vmem %s415_s0, %s315_s9  ;;  %s121_s17 = scalar_lea.vmem %s416_s1, %s312_s14 }
  0x10   : > { %v128_v0 = vld [vmem:[%s358_s12 + $0x8] sm:$0x3]  ;;  %v129_v1 = vld [vmem:[%s358_s12 + $0xa] sm:$0x3]  ;;  %v124_v2 = vld [vmem:[%s358_s12] sm:$0x3] }
  0x11   : > { %v157_v3 = vsel %vm140_vm0, %v128_v0, 4286644096  ;;  %v160_v4 = vsel %vm140_vm0, %v129_v1, 4286644096  ;;  %v125_v5 = vld [vmem:[%s358_s12 + $0x2] sm:$0x3] }
  0x12   : > { %v162_v6 = vmax.bf16 %v160_v4, %v157_v3  ;;  %v143_v7 = vsel %vm140_vm0, %v124_v2, 4286644096  ;;  %v146_v8 = vsel %vm140_vm0, %v125_v5, 4286644096  ;;  %v130_v9 = vld [vmem:[%s358_s12 + $0xc] sm:$0x3] }
  0x13   : > { %v148_v10 = vmax.bf16 %v146_v8, %v143_v7  ;;  %v131_v11 = vld [vmem:[%s358_s12 + $0xe] sm:$0x3]  ;;  %v164_v12 = vsel %vm140_vm0, %v130_v9, 4286644096  ;;  %v126_v13 = vld [vmem:[%s358_s12 + $0x4] sm:$0x3] }
  0x14   : > { %210 = vrot.lane.b32.xlu1 %v162_v6, %s333_s13  ;;  %v167_v14 = vsel %vm140_vm0, %v131_v11, 4286644096  ;;  %v127_v15 = vld [vmem:[%s358_s12 + $0x6] sm:$0x3]  ;;  %v150_v16 = vsel %vm140_vm0, %v126_v13, 4286644096 }
  0x15   : > { %206 = vrot.lane.b32.xlu0 %v148_v10, %s333_s13  ;;  %v169_v17 = vmax.bf16 %v167_v14, %v164_v12  ;;  %v153_v18 = vsel %vm140_vm0, %v127_v15, 4286644096  ;;  %v134_v19 = vld [vmem:[%s358_s12 + $0x14] sm:$0x3]  ;;  %v135_v20 = vld [vmem:[%s358_s12 + $0x16] sm:$0x3] }
  0x16   : > { %v155_v21 = vmax.bf16 %v153_v18, %v150_v16  ;;  %v178_v22 = vsel %vm140_vm0, %v134_v19, 4286644096  ;;  %v181_v23 = vsel %vm140_vm0, %v135_v20, 4286644096  ;;  %v132_v24 = vld [vmem:[%s358_s12 + $0x10] sm:$0x3] }
  0x17   : > { %v133_v25 = vld [vmem:[%s358_s12 + $0x12] sm:$0x3]  ;;  %v171_v26 = vsel %vm140_vm0, %v132_v24, 4286644096  ;;  %v138_v27 = vld [vmem:[%s358_s12 + $0x1c] sm:$0x3]  ;;  %v183_v28 = vmax.bf16 %v181_v23, %v178_v22 }
  0x18   : > { %212 = vrot.lane.b32.xlu1 %v169_v17, %s333_s13  ;;  %v174_v29 = vsel %vm140_vm0, %v133_v25, 4286644096  ;;  %v139_v30 = vld [vmem:[%s358_s12 + $0x1e] sm:$0x3]  ;;  %v192_v31 = vsel %vm140_vm0, %v138_v27, 4286644096 }
  0x19   : > { %208 = vrot.lane.b32.xlu0 %v155_v21, %s333_s13  ;;  %v176_v32 = vmax.bf16 %v174_v29, %v171_v26  ;;  %v195_v33 = vsel %vm140_vm0, %v139_v30, 4286644096  ;;  %v136_v34 = vld [vmem:[%s358_s12 + $0x18] sm:$0x3]  ;;  %v137_v35 = vld [vmem:[%s358_s12 + $0x1a] sm:$0x3] }
  0x1a   : > { %v185_v36 = vsel %vm140_vm0, %v136_v34, 4286644096  ;;  %v188_v37 = vsel %vm140_vm0, %v137_v35, 4286644096  ;;  %v197_v38 = vmax.bf16 %v195_v33, %v192_v31 }
  0x1b   : > { %v190_v39 = vmax.bf16 %v188_v37, %v185_v36 }
  0x1c   : > { %216 = vrot.lane.b32.xlu1 %v183_v28, %s333_s13 }
  0x1d   : > { %214 = vrot.lane.b32.xlu0 %v176_v32, %s333_s13 }
  0x20   : > { %220 = vrot.lane.b32.xlu1 %v197_v38, %s333_s13 }
  0x21   : > { %218 = vrot.lane.b32.xlu0 %v190_v39, %s333_s13 }
  0x86   : > { %v211_v40 = vpop.permute.xlu1 %210 }
  0x87   : > { %v232_v41 = vmax.bf16 %v211_v40, %v162_v6  ;;  %v207_v42 = vpop.permute.xlu0 %206 }
  0x88   : > { %v230_v43 = vmax.bf16 %v207_v42, %v148_v10 }
  0x89   : > { %241 = vst.msk [vmem:[%s121_s17 + $0x4] sm:$0x3] %vm238_vm1, %v232_v41 }
  0x8a   : > { %239 = vst.msk [vmem:[%s121_s17] sm:$0x3] %vm238_vm1, %v230_v43  ;;  %v213_v44 = vpop.permute.xlu1 %212 }
  0x8b   : > { %v233_v45 = vmax.bf16 %v213_v44, %v169_v17  ;;  %v209_v46 = vpop.permute.xlu0 %208 }
  0x8c   : > { %v231_v47 = vmax.bf16 %v209_v46, %v155_v21 }
  0x8d   : > { %242 = vst.msk [vmem:[%s121_s17 + $0x6] sm:$0x3] %vm238_vm1, %v233_v45 }
  0x8e   : > { %240 = vst.msk [vmem:[%s121_s17 + $0x2] sm:$0x3] %vm238_vm1, %v231_v47  ;;  %v217_v48 = vpop.permute.xlu1 %216 }
  0x8f   : > { %v235_v49 = vmax.bf16 %v217_v48, %v183_v28  ;;  %v215_v50 = vpop.permute.xlu0 %214 }
  0x90   : > { %v234_v51 = vmax.bf16 %v215_v50, %v176_v32 }
  0x91   : > { %244 = vst.msk [vmem:[%s121_s17 + $0xa] sm:$0x3] %vm238_vm1, %v235_v49 }
  0x92   : > { %243 = vst.msk [vmem:[%s121_s17 + $0x8] sm:$0x3] %vm238_vm1, %v234_v51  ;;  %v221_v52 = vpop.permute.xlu1 %220 }
  0x93   : > { %v237_v53 = vmax.bf16 %v221_v52, %v197_v38  ;;  %v219_v54 = vpop.permute.xlu0 %218 }
  0x94   : > { %v236_v55 = vmax.bf16 %v219_v54, %v190_v39 }
  0x95   : > { %246 = vst.msk [vmem:[%s121_s17 + $0xe] sm:$0x3] %vm238_vm1, %v237_v53 }
  0x96   : > { %245 = vst.msk [vmem:[%s121_s17 + $0xc] sm:$0x3] %vm238_vm1, %v236_v55 }
  0x97 PF: > { %s11_s6 = sadd.s32 1, %s331_s6  }
  0x98   : > { %p8_p4 = scmp.ge.s32.totalorder %s11_s6, 4  }
  0x9a   :  { %10 = sbr.rel (!%p8_p4) target bundleno = 1 (0x1), region = 54 }

// kernel: vgg_forward.17
= control target key start
LH: loop header
LB: loop body
LE: loop exit
PB: predicated region body
PF: predicated region fallthrough
CT: control target
= control target key end

     0   :  { %s639_s12 = smov 0   ;;  %s641_s13 = smov 0   ;;  %s706_s0 = inlined_call_operand.vmem [shape: bf16[64,128], index: 0, kind: input, shape index: {}]   ;;  %s707_s1 = inlined_call_operand.vmem [shape: bf16[128,128], index: 1, kind: input, shape index: {}]   ;;  %s708_s2 = inlined_call_operand.vmem [shape: f32[1,128], index: 2, kind: input, shape index: {}]   ;;  %s709_s3 = inlined_call_operand.vmem [shape: bf16[64,128], index: 3, kind: output, shape index: {}]  }
   0x1   :  { %s643_s14 = smov 0  }
   0x2 LB: > { %s22_s15 = sadd.s32 1, %s613_s13  ;;  %p494_p0 = scmp.ge.s32.totalorder %s617_s14, 1  ;;  %s617_s14 = sphi %s643_s14, %s13_s14   ;;  %s613_s13 = sphi %s641_s13, %s711_s13   ;;  %s609_s12 = sphi %s639_s12, %s710_s12  }
   0x3   : > { %p23_p1 = scmp.ge.s32.totalorder %s22_s15, 2  ;;  %p169_p2 = scmp.lt.s32.totalorder %s617_s14, 3 }
   0x5   : > { %s713_s15 = smov (%p23_p1, %s22_s15), 0  ;;  %p170_p3 = pnand %p494_p0, %p169_p2 }
   0x6   : > { %v585_v0 = vld [vmem:[%s707_s1] sm:$0xff] (!%p170_p3)   ;;  %s495_s18 = sshll.u32 (!%p170_p3), %s609_s12, 2  ;;  %v586_v1 = vld [vmem:[%s707_s1 + $0x8] sm:$0xff] (!%p170_p3)   ;;  %v587_v2 = vld [vmem:[%s707_s1 + $0x10] sm:$0xff] (!%p170_p3)  }
   0x7   : > { %173 = sbr.rel (%p170_p3) target bundleno = 261 (0x105), region = 32  ;;  %p204_p4 = scmp.lt.s32.totalorder (!%p170_p3), %s495_s18, 7  ;;  %541 = vmatprep.subr.bf16.mxu0 (!%p170_p3), %v585_v0  ;;  %v588_v3 = vld [vmem:[%s707_s1 + $0x18] sm:$0xff] (!%p170_p3)   ;;  %v589_v5 = vld [vmem:[%s707_s1 + $0x20] sm:$0xff] (!%p170_p3)   ;;  %v590_v6 = vld [vmem:[%s707_s1 + $0x28] sm:$0xff] (!%p170_p3)  }
   0x8   : > { %542 = vmatpush3.bf16.msra.mxu0 (!%p170_p3), %v585_v0  ;;  %v591_v7 = vld [vmem:[%s707_s1 + $0x30] sm:$0xff] (!%p170_p3)   ;;  %v592_v8 = vld [vmem:[%s707_s1 + $0x38] sm:$0xff] (!%p170_p3)   ;;  %v499_v10 = vld [vmem:[%s708_s2] ss:$0 sm:$0xff] (!%p170_p3) }
   0x9   : > { %543 = vmatprep.subr.bf16.mxu0 (!%p170_p3), %v586_v1 }
   0xc   : > { %544 = vmatpush3.bf16.msra.mxu0 (!%p170_p3), %v586_v1 }
   0xd   : > { %545 = vmatprep.subr.bf16.mxu0 (!%p170_p3), %v587_v2 }
   0xe   : > { %s715_s18 = smov (!%p204_p4, %s495_s18), 7 }
   0xf   : > { %s496_s23 = sshll.u32 %s715_s18, 2 }
  0x10   : > { %s207_s26 = scalar_lea.vmem %s706_s0, %s496_s23  ;;  %546 = vmatpush3.bf16.msra.mxu0 %v587_v2  ;;  %s223_s17 = scalar_lea.vmem %s709_s3, %s496_s23 }
  0x11   : > { %v593_v4 = vld [vmem:[%s207_s26] sm:$0xff]   ;;  %547 = vmatprep.subr.bf16.mxu0 %v588_v3  ;;  %v594_v9 = vld [vmem:[%s207_s26 + $0x8] sm:$0xff]  }
  0x12   : > { %557 = vmatprep.mubr.bf16.mxu0 %v593_v4 }
  0x14   : > { %548 = vmatpush3.bf16.msra.mxu0 %v588_v3 }
  0x15   : > { %549 = vmatprep.subr.bf16.mxu0 %v589_v5 }
  0x18   : > { %550 = vmatpush3.bf16.msra.mxu0 %v589_v5 }
  0x19   : > { %551 = vmatprep.subr.bf16.mxu0 %v590_v6 }
  0x1c   : > { %552 = vmatpush3.bf16.msra.mxu0 %v590_v6 }
  0x1d   : > { %553 = vmatprep.subr.bf16.mxu0 %v591_v7 }
  0x20   : > { %554 = vmatpush3.bf16.msra.mxu0 %v591_v7 }
  0x21   : > { %555 = vmatprep.subr.bf16.mxu0 %v592_v8 }
  0x24   : > { %556 = vmatpush3.bf16.msra.mxu0 %v592_v8 }
  0x27   : > { %558 = vmatmul.mubr.bf16.vlgmr.msra.gmra.mrb[0].mxu0 %v594_v9 }
  0xfa   : > { %v559_v11 = vpop.f32.mrb[0].mxu0 }
  0xfb   : > { %v356_v12 = vadd.f32 %v559_v11, %v499_v10  ;;  %v347_v13 = vpop.f32.mrb[1].mxu0 }
  0xfc   : > { %v348_v14 = vadd.f32 %v499_v10, %v347_v13  ;;  %v560_v15 = vpop.f32.mrb[2].mxu0 }
  0xfd   : > { %v359_v16 = vadd.f32 %v560_v15, %v499_v10  ;;  %v350_v17 = vpop.f32.mrb[3].mxu0  ;;  %v364_v19 = vmax.f32 %v356_v12, 0.0 }
  0xfe   : > { %v351_v18 = vadd.f32 %v499_v10, %v350_v17  ;;  %v362_v21 = vmax.f32 %v348_v14, 0.0 }
  0xff   : > { %v365_v20 = vmax.f32 %v359_v16, 0.0 }
 0x100   : > { %v363_v22 = vmax.f32 %v351_v18, 0.0 }
 0x101   : > { %v528_v23 = vpack.c.bf16 %v365_v20, %v364_v19 }
 0x102   : > { %v523_v24 = vpack.c.bf16 %v363_v22, %v362_v21 }
 0x103   : > { %530 = vst [vmem:[%s223_s17 + $0x8] sm:$0xff] %v528_v23  }
 0x104   : > { %524 = vst [vmem:[%s223_s17] sm:$0xff] %v523_v24  }
 0x105 PF: > { %s13_s14 = sadd.s32 1, %s617_s14   ;;  %s710_s12 = smov %s613_s13 }
 0x106   : > { %p10_p5 = scmp.ge.s32.totalorder %s13_s14, 4   ;;  %s711_s13 = smov %s713_s15 }
 0x108   :  { %12 = sbr.rel (!%p10_p5) target bundleno = 2 (0x2), region = 68 }

// kernel: vgg_forward.19
= control target key start
LH: loop header
LB: loop body
LE: loop exit
PB: predicated region body
PF: predicated region fallthrough
CT: control target
= control target key end

     0   :  { %s261_s6 = smov 0   ;;  %s290_s0 = inlined_call_operand.vmem [shape: bf16[8,2,4,16], index: 0, kind: input, shape index: {}]   ;;  %s291_s1 = inlined_call_operand.vmem [shape: bf16[8,4,16], index: 1, kind: output, shape index: {}]  }
   0x1 LB: > { %s222_s7 = sadd.s32 4294967295, %s249_s6   ;;  %p226_p0 = scmp.ge.s32.totalorder %s249_s6, 1  ;;  %s249_s6 = sphi %s261_s6, %s11_s6  }
   0x2   : > { %p89_p1 = scmp.lt.s32.totalorder %s249_s6, 3 }
   0x4   : > { %p90_p2 = pnand %p226_p0, %p89_p1 }
   0x5   : > { %s227_s8 = sshll.u32 (!%p90_p2), %s222_s7, 2  ;;  %vm132_vm0 = vcmask (!%p90_p2), 123904  }
   0x6   : > { %93 = sbr.rel (%p90_p2) target bundleno = 25 (0x19), region = 24  ;;  %p111_p3 = scmp.lt.s32.totalorder (!%p90_p2), %s227_s8, 7 }
   0xd   : > { %s293_s8 = smov (!%p111_p3, %s227_s8), 7 }
   0xe   : > { %s234_s9 = sshll.u32 %s293_s8, 2  ;;  %s231_s10 = sshll.u32 %s293_s8, 1 }
   0xf   : > { %s115_s13 = scalar_lea.vmem %s290_s0, %s234_s9  ;;  %s121_s16 = scalar_lea.vmem %s291_s1, %s231_s10 }
  0x10   : > { %v124_v0 = vld [vmem:[%s115_s13] sm:$0x3]  ;;  %v125_v1 = vld [vmem:[%s115_s13 + $0x2] sm:$0x3]  ;;  %v126_v2 = vld [vmem:[%s115_s13 + $0x4] sm:$0x3] }
  0x11   : > { %v135_v3 = vsel %vm132_vm0, %v124_v0, 4286644096  ;;  %v138_v4 = vsel %vm132_vm0, %v125_v1, 4286644096  ;;  %v127_v5 = vld [vmem:[%s115_s13 + $0x6] sm:$0x3] }
  0x12   : > { %v140_v6 = vmax.bf16 %v138_v4, %v135_v3  ;;  %v142_v7 = vsel %vm132_vm0, %v126_v2, 4286644096  ;;  %v145_v8 = vsel %vm132_vm0, %v127_v5, 4286644096  ;;  %v128_v9 = vld [vmem:[%s115_s13 + $0x8] sm:$0x3] }
  0x13   : > { %v147_v10 = vmax.bf16 %v145_v8, %v142_v7  ;;  %v129_v11 = vld [vmem:[%s115_s13 + $0xa] sm:$0x3]  ;;  %v149_v12 = vsel %vm132_vm0, %v128_v9, 4286644096  ;;  %v130_v13 = vld [vmem:[%s115_s13 + $0xc] sm:$0x3] }
  0x14   : > { %162 = vst.msk [vmem:[%s121_s16] sm:$0x3] %vm132_vm0, %v140_v6  ;;  %v152_v14 = vsel %vm132_vm0, %v129_v11, 4286644096  ;;  %v131_v15 = vld [vmem:[%s115_s13 + $0xe] sm:$0x3] }
  0x15   : > { %v156_v16 = vsel %vm132_vm0, %v130_v13, 4286644096  ;;  %163 = vst.msk [vmem:[%s121_s16 + $0x2] sm:$0x3] %vm132_vm0, %v147_v10  ;;  %v154_v17 = vmax.bf16 %v152_v14, %v149_v12  ;;  %v159_v18 = vsel %vm132_vm0, %v131_v15, 4286644096 }
  0x16   : > { %v161_v19 = vmax.bf16 %v159_v18, %v156_v16 }
  0x17   : > { %164 = vst.msk [vmem:[%s121_s16 + $0x4] sm:$0x3] %vm132_vm0, %v154_v17 }
  0x18   : > { %165 = vst.msk [vmem:[%s121_s16 + $0x6] sm:$0x3] %vm132_vm0, %v161_v19 }
  0x19 PF: > { %s11_s6 = sadd.s32 1, %s249_s6  }
  0x1a   : > { %p8_p4 = scmp.ge.s32.totalorder %s11_s6, 4  }
  0x1c   :  { %10 = sbr.rel (!%p8_p4) target bundleno = 1 (0x1), region = 54 }

// kernel: vgg_forward.18
= control target key start
LH: loop header
LB: loop body
LE: loop exit
PB: predicated region body
PF: predicated region fallthrough
CT: control target
= control target key end

     0   :  { %s752_s12 = smov 0   ;;  %s754_s13 = smov 0   ;;  %s840_s0 = inlined_call_operand.vmem [shape: bf16[64,256], index: 0, kind: input, shape index: {}]   ;;  %s841_s1 = inlined_call_operand.vmem [shape: bf16[256,128], index: 1, kind: input, shape index: {}]   ;;  %s842_s2 = inlined_call_operand.vmem [shape: f32[1,128], index: 2, kind: input, shape index: {}]   ;;  %s843_s3 = inlined_call_operand.vmem [shape: bf16[64,128], index: 3, kind: output, shape index: {}]  }
   0x1   :  { %s756_s14 = smov 0  }
   0x2 LB: > { %s22_s15 = sadd.s32 1, %s726_s13  ;;  %p569_p0 = scmp.ge.s32.totalorder %s730_s14, 1  ;;  %s730_s14 = sphi %s756_s14, %s13_s14   ;;  %s726_s13 = sphi %s754_s13, %s845_s13   ;;  %s722_s12 = sphi %s752_s12, %s844_s12  }
   0x3   : > { %p23_p1 = scmp.ge.s32.totalorder %s22_s15, 2  ;;  %p170_p2 = scmp.lt.s32.totalorder %s730_s14, 3 }
   0x5   : > { %s847_s15 = smov (%p23_p1, %s22_s15), 0  ;;  %p171_p3 = pnand %p569_p0, %p170_p2 }
   0x6   : > { %v686_v0 = vld [vmem:[%s841_s1 + $0x40] sm:$0xff] (!%p171_p3)   ;;  %s570_s18 = sshll.u32 (!%p171_p3), %s722_s12, 2  ;;  %v688_v2 = vld [vmem:[%s841_s1 + $0x48] sm:$0xff] (!%p171_p3)   ;;  %v690_v4 = vld [vmem:[%s841_s1 + $0x50] sm:$0xff] (!%p171_p3)  }
   0x7   : > { %174 = sbr.rel (%p171_p3) target bundleno = 263 (0x107), region = 32  ;;  %v687_v1 = vld [vmem:[%s841_s1] sm:$0xff] (!%p171_p3)   ;;  %618 = vmatprep.subr.bf16.mxu0 (!%p171_p3), %v686_v0  ;;  %646 = vmatprep.subr.bf16.mxu1 (!%p171_p3), %v686_v0  ;;  %v689_v3 = vld [vmem:[%s841_s1 + $0x8] sm:$0xff] (!%p171_p3)   ;;  %p206_p4 = scmp.lt.s32.totalorder (!%p171_p3), %s570_s18, 7  ;;  %v691_v5 = vld [vmem:[%s841_s1 + $0x10] sm:$0xff] (!%p171_p3)  }
   0x8   : > { %619 = vmatpush3.bf16.msra.mxu0 (!%p171_p3), %v687_v1  ;;  %654 = vmatpush3.bf16.msra.mxu1 (!%p171_p3), %v687_v1  ;;  %v692_v6 = vld [vmem:[%s841_s1 + $0x58] sm:$0xff] (!%p171_p3)   ;;  %v694_v8 = vld [vmem:[%s841_s1 + $0x60] sm:$0xff] (!%p171_p3)   ;;  %v696_v10 = vld [vmem:[%s841_s1 + $0x68] sm:$0xff] (!%p171_p3)  }
   0x9   : > { %620 = vmatprep.subr.bf16.mxu0 (!%p171_p3), %v688_v2  ;;  %647 = vmatprep.subr.bf16.mxu1 (!%p171_p3), %v688_v2  ;;  %v693_v7 = vld [vmem:[%s841_s1 + $0x18] sm:$0xff] (!%p171_p3)   ;;  %v695_v9 = vld [vmem:[%s841_s1 + $0x20] sm:$0xff] (!%p171_p3)   ;;  %v697_v13 = vld [vmem:[%s841_s1 + $0x28] sm:$0xff] (!%p171_p3)  }
   0xa   : > { %v698_v14 = vld [vmem:[%s841_s1 + $0x70] sm:$0xff] (!%p171_p3)   ;;  %v700_v16 = vld [vmem:[%s841_s1 + $0x78] sm:$0xff] (!%p171_p3)   ;;  %v575_v22 = vld [vmem:[%s842_s2] ss:$0 sm:$0xff] (!%p171_p3) }
   0xb   : > { %v699_v15 = vld [vmem:[%s841_s1 + $0x30] sm:$0xff] (!%p171_p3)   ;;  %v701_v17 = vld [vmem:[%s841_s1 + $0x38] sm:$0xff] (!%p171_p3)  }
   0xc   : > { %621 = vmatpush3.bf16.msra.mxu0 (!%p171_p3), %v689_v3  ;;  %655 = vmatpush3.bf16.msra.mxu1 (!%p171_p3), %v689_v3 }
   0xd   : > { %622 = vmatprep.subr.bf16.mxu0 (!%p171_p3), %v690_v4  ;;  %648 = vmatprep.subr.bf16.mxu1 (!%p171_p3), %v690_v4 }
   0xe   : > { %s849_s18 = smov (!%p206_p4, %s570_s18), 7 }
   0xf   : > { %s602_s6 = sshll.u32 %s849_s18, 3  ;;  %s574_s5 = sshll.u32 %s849_s18, 2 }
  0x10   : > { %623 = vmatpush3.bf16.msra.mxu0 %v691_v5  ;;  %656 = vmatpush3.bf16.msra.mxu1 %v691_v5  ;;  %s210_s11 = scalar_lea.vmem %s840_s0, %s602_s6  ;;  %s226_s8 = scalar_lea.vmem %s843_s3, %s574_s5 }
  0x11   : > { %624 = vmatprep.subr.bf16.mxu0 %v692_v6  ;;  %649 = vmatprep.subr.bf16.mxu1 %v692_v6  ;;  %v704_v11 = vld [vmem:[%s210_s11 + $0x4] ss:$8 sps:$4 sm:$0xff]   ;;  %v707_v12 = vld [vmem:[%s210_s11 + $0x14] ss:$8 sps:$4 sm:$0xff]   ;;  %v702_v18 = vld [vmem:[%s210_s11] ss:$8 sps:$4 sm:$0xff]  }
  0x12   : > { %420 = vmatprep.mubr.bf16.mxu0 %v704_v11  ;;  %428 = vmatprep.mubr.bf16.mxu1 %v707_v12  ;;  %v705_v19 = vld [vmem:[%s210_s11 + $0x10] ss:$8 sps:$4 sm:$0xff]  }
  0x14   : > { %625 = vmatpush3.bf16.msra.mxu0 %v693_v7  ;;  %657 = vmatpush3.bf16.msra.mxu1 %v693_v7 }
  0x15   : > { %626 = vmatprep.subr.bf16.mxu0 %v694_v8  ;;  %650 = vmatprep.subr.bf16.mxu1 %v694_v8 }
  0x18   : > { %627 = vmatpush3.bf16.msra.mxu0 %v695_v9  ;;  %658 = vmatpush3.bf16.msra.mxu1 %v695_v9 }
  0x19   : > { %628 = vmatprep.subr.bf16.mxu0 %v696_v10  ;;  %651 = vmatprep.subr.bf16.mxu1 %v696_v10 }
  0x1c   : > { %629 = vmatpush3.bf16.msra.mxu0 %v697_v13  ;;  %659 = vmatpush3.bf16.msra.mxu1 %v697_v13 }
  0x1d   : > { %630 = vmatprep.subr.bf16.mxu0 %v698_v14  ;;  %652 = vmatprep.subr.bf16.mxu1 %v698_v14 }
  0x20   : > { %631 = vmatpush3.bf16.msra.mxu0 %v699_v15  ;;  %660 = vmatpush3.bf16.msra.mxu1 %v699_v15 }
  0x21   : > { %632 = vmatprep.subr.bf16.mxu0 %v700_v16  ;;  %653 = vmatprep.subr.bf16.mxu1 %v700_v16 }
  0x24   : > { %633 = vmatpush3.bf16.msra.mxu0 %v701_v17  ;;  %661 = vmatpush3.bf16.msra.mxu1 %v701_v17 }
  0x27   : > { %421 = vmatmul.mubr.bf16.vlgmr.msra.gmra.mrb[0].mxu0 %v702_v18  ;;  %429 = vmatmul.mubr.bf16.vlgmr.msra.gmra.mrb[0].mxu1 %v705_v19 }
  0xfa   : > { %v634_v20 = vpop.f32.mrb[0].mxu0  ;;  %v640_v21 = vpop.f32.mrb[0].mxu1 }
  0xfb   : > { %v635_v23 = vpop.f32.mrb[1].mxu0  ;;  %v641_v24 = vpop.f32.mrb[1].mxu1 }
  0xfc   : > { %v636_v25 = vadd.f32 %v635_v23, %v634_v20  ;;  %v642_v26 = vadd.f32 %v641_v24, %v640_v21  ;;  %v637_v27 = vpop.f32.mrb[2].mxu0  ;;  %v643_v28 = vpop.f32.mrb[2].mxu1 }
  0xfd   : > { %v638_v29 = vpop.f32.mrb[3].mxu0  ;;  %v644_v30 = vpop.f32.mrb[3].mxu1 }
  0xfe   : > { %v423_v31 = vadd.f32 %v636_v25, %v575_v22  ;;  %v431_v32 = vadd.f32 %v642_v26, %v575_v22  ;;  %v639_v33 = vadd.f32 %v638_v29, %v637_v27  ;;  %v645_v34 = vadd.f32 %v644_v30, %v643_v28 }
 0x100   : > { %v426_v35 = vadd.f32 %v639_v33, %v575_v22  ;;  %v434_v36 = vadd.f32 %v645_v34, %v575_v22  ;;  %v437_v37 = vmax.f32 %v423_v31, 0.0  ;;  %v439_v38 = vmax.f32 %v431_v32, 0.0 }
 0x102   : > { %v438_v39 = vmax.f32 %v426_v35, 0.0  ;;  %v440_v40 = vmax.f32 %v434_v36, 0.0 }
 0x104   : > { %v610_v41 = vpack.c.bf16 %v438_v39, %v437_v37  ;;  %v615_v42 = vpack.c.bf16 %v440_v40, %v439_v38 }
 0x106   : > { %611 = vst [vmem:[%s226_s8] sm:$0xff] %v610_v41   ;;  %617 = vst [vmem:[%s226_s8 + $0x8] sm:$0xff] %v615_v42  }
 0x107 PF: > { %s13_s14 = sadd.s32 1, %s730_s14   ;;  %s844_s12 = smov %s726_s13 }
 0x108   : > { %p10_p5 = scmp.ge.s32.totalorder %s13_s14, 4   ;;  %s845_s13 = smov %s847_s15 }
 0x10a   :  { %12 = sbr.rel (!%p10_p5) target bundleno = 2 (0x2), region = 68 }

// kernel: vgg_forward.20
= control target key start
LH: loop header
LB: loop body
LE: loop exit
PB: predicated region body
PF: predicated region fallthrough
CT: control target
= control target key end

     0   :  { %s782_s15 = smov 0   ;;  %s784_s16 = smov 0   ;;  %s882_s0 = inlined_call_operand.vmem [shape: bf16[32,256], index: 0, kind: input, shape index: {}]   ;;  %s883_s1 = inlined_call_operand.vmem [shape: bf16[256,128], index: 1, kind: input, shape index: {}]   ;;  %s884_s2 = inlined_call_operand.vmem [shape: f32[1,128], index: 2, kind: input, shape index: {}]   ;;  %s885_s3 = inlined_call_operand.vmem [shape: bf16[32,128], index: 3, kind: output, shape index: {0}]   ;;  %s886_s4 = inlined_call_operand.vmem [shape: f32[2,128], index: 4, kind: output, shape index: {1}]  }
   0x1   :  { %s786_s17 = smov 0  }
   0x2 LB: > { %s24_s18 = sadd.s32 1, %s750_s16  ;;  %p627_p0 = scmp.ge.s32.totalorder %s754_s17, 1  ;;  %s754_s17 = sphi %s786_s17, %s15_s17   ;;  %s750_s16 = sphi %s784_s16, %s888_s16   ;;  %s746_s15 = sphi %s782_s15, %s887_s15  }
   0x3   : > { %p25_p1 = scmp.ge.s32.totalorder %s24_s18, 2  ;;  %p198_p2 = scmp.lt.s32.totalorder %s754_s17, 3 }
   0x5   : > { %s890_s18 = smov (%p25_p1, %s24_s18), 0  ;;  %p199_p3 = pnand %p627_p0, %p198_p2 }
   0x6   : > { %s628_s19 = sshll.u32 (!%p199_p3), %s746_s15, 1  ;;  %p633_p5 = scmp.ne.s32.totalorder (!%p199_p3), %s746_s15, 0 }
   0x7   : > { %202 = sbr.rel (%p199_p3) target bundleno = 293 (0x125), region = 32  ;;  %p240_p4 = scmp.lt.s32.totalorder (!%p199_p3), %s628_s19, 3 }
   0xe   : > { %s892_s19 = smov (!%p240_p4, %s628_s19), 3  ;;  %270 = sbr.rel (%p633_p5) target bundleno = 21 (0x15), region = 36 }
   0xf   : > { %s658_s20 = sshll.u32 %s892_s19, 3  ;;  %s632_s21 = sshll.u32 %s892_s19, 2  ;;  %v756_v0 = vmov (!%p633_p5), 0.0  }
  0x10   : > { %s803_s24 = scalar_lea.vmem %s882_s0, %s658_s20  ;;  %s808_s27 = scalar_lea.vmem %s885_s3, %s632_s21  ;;  %271 = vst [vmem:[%s886_s4] sm:$0x3] (!%p633_p5), %v756_v0 }
  0x15 PF: > { %v713_v1 = vld [vmem:[%s883_s1 + $0x40] sm:$0xff]   ;;  %v715_v3 = vld [vmem:[%s883_s1 + $0x48] sm:$0xff]   ;;  %v717_v5 = vld [vmem:[%s883_s1 + $0x50] sm:$0xff]   ;;  %vm477_vm0 = vcmask 1040384  }
  0x16   : > { %v714_v2 = vld [vmem:[%s883_s1] sm:$0xff]   ;;  %666 = vmatprep.subr.bf16.mxu0 %v713_v1  ;;  %v716_v4 = vld [vmem:[%s883_s1 + $0x8] sm:$0xff]   ;;  %v718_v6 = vld [vmem:[%s883_s1 + $0x10] sm:$0xff]  }
  0x17   : > { %667 = vmatpush3.bf16.msra.mxu0 %v714_v2  ;;  %v719_v7 = vld [vmem:[%s883_s1 + $0x58] sm:$0xff]   ;;  %v721_v9 = vld [vmem:[%s883_s1 + $0x60] sm:$0xff]   ;;  %v723_v11 = vld [vmem:[%s883_s1 + $0x68] sm:$0xff]  }
  0x18   : > { %668 = vmatprep.subr.bf16.mxu0 %v715_v3  ;;  %v720_v8 = vld [vmem:[%s883_s1 + $0x18] sm:$0xff]   ;;  %v722_v10 = vld [vmem:[%s883_s1 + $0x20] sm:$0xff]   ;;  %v724_v13 = vld [vmem:[%s883_s1 + $0x28] sm:$0xff]  }
  0x19   : > { %v731_v12 = vld [vmem:[%s803_s24 + $0x4] ss:$8 sps:$4 sm:$0xff]   ;;  %v725_v14 = vld [vmem:[%s883_s1 + $0x70] sm:$0xff]   ;;  %v727_v16 = vld [vmem:[%s883_s1 + $0x78] sm:$0xff]  }
  0x1a   : > { %451 = vmatprep.mubr.bf16.mxu0 %v731_v12  ;;  %v726_v15 = vld [vmem:[%s883_s1 + $0x30] sm:$0xff]   ;;  %v728_v17 = vld [vmem:[%s883_s1 + $0x38] sm:$0xff]   ;;  %v729_v18 = vld [vmem:[%s803_s24] ss:$8 sps:$4 sm:$0xff]  }
  0x1b   : > { %669 = vmatpush3.bf16.msra.mxu0 %v716_v4  ;;  %v634_v20 = vld [vmem:[%s884_s2] ss:$0 sm:$0xff] }
  0x1c   : > { %670 = vmatprep.subr.bf16.mxu0 %v717_v5  ;;  %v476_v45 = vld [vmem:[%s886_s4] sm:$0x3] }
  0x1f   : > { %671 = vmatpush3.bf16.msra.mxu0 %v718_v6 }
  0x20   : > { %672 = vmatprep.subr.bf16.mxu0 %v719_v7 }
  0x23   : > { %673 = vmatpush3.bf16.msra.mxu0 %v720_v8 }
  0x24   : > { %674 = vmatprep.subr.bf16.mxu0 %v721_v9 }
  0x27   : > { %675 = vmatpush3.bf16.msra.mxu0 %v722_v10 }
  0x28   : > { %676 = vmatprep.subr.bf16.mxu0 %v723_v11 }
  0x2b   : > { %677 = vmatpush3.bf16.msra.mxu0 %v724_v13 }
  0x2c   : > { %678 = vmatprep.subr.bf16.mxu0 %v725_v14 }
  0x2f   : > { %679 = vmatpush3.bf16.msra.mxu0 %v726_v15 }
  0x30   : > { %680 = vmatprep.subr.bf16.mxu0 %v727_v16 }
  0x33   : > { %681 = vmatpush3.bf16.msra.mxu0 %v728_v17 }
  0x36   : > { %452 = vmatmul.mubr.bf16.vlgmr.msra.gmra.mrb[0].mxu0 %v729_v18 }
 0x109   : > { %v682_v19 = vpop.f32.mrb[0].mxu0 }
 0x10a   : > { %v683_v21 = vpop.f32.mrb[1].mxu0 }
 0x10b   : > { %v684_v22 = vadd.f32 %v683_v21, %v682_v19  ;;  %v685_v23 = vpop.f32.mrb[2].mxu0 }
 0x10c   : > { %v686_v24 = vpop.f32.mrb[3].mxu0 }
 0x10d   : > { %v454_v25 = vadd.f32 %v684_v22, %v634_v20  ;;  %v687_v26 = vadd.f32 %v686_v24, %v685_v23 }
 0x10f   : > { %v457_v27 = vadd.f32 %v687_v26, %v634_v20  ;;  %v467_v28 = vmul.f32 %v454_v25, %v454_v25 }
 0x111   : > { %v460_v29 = vadd.f32 %v457_v27, %v454_v25  ;;  %v468_v30 = vmul.f32 %v457_v27, %v457_v27  ;;  %v664_v31 = vpack.c.bf16 %v457_v27, %v454_v25 }
 0x113   : > { %v461_v32 = vrot.slane %v460_v29, 4  ;;  %v469_v33 = vadd.f32 %v468_v30, %v467_v28  ;;  %665 = vst [vmem:[%s808_s27] sm:$0xff] %v664_v31  }
 0x115   : > { %v462_v34 = vadd.f32 %v461_v32, %v460_v29  ;;  %v470_v35 = vrot.slane %v469_v33, 4 }
 0x117   : > { %v463_v36 = vrot.slane %v462_v34, 2  ;;  %v471_v37 = vadd.f32 %v470_v35, %v469_v33 }
 0x119   : > { %v464_v38 = vadd.f32 %v463_v36, %v462_v34  ;;  %v472_v39 = vrot.slane %v471_v37, 2 }
 0x11b   : > { %v465_v40 = vrot.slane %v464_v38, 1  ;;  %v473_v41 = vadd.f32 %v472_v39, %v471_v37 }
 0x11d   : > { %v474_v42 = vrot.slane %v473_v41, 1  ;;  %v466_v43 = vadd.f32 %v465_v40, %v464_v38 }
 0x11f   : > { %v475_v44 = vadd.f32 %v474_v42, %v473_v41 }
 0x121   : > { %v478_v46 = vsel %vm477_vm0, %v466_v43, %v475_v44 }
 0x122   : > { %v479_v47 = vadd.f32 %v478_v46, %v476_v45 }
 0x124   : > { %480 = vst [vmem:[%s886_s4] sm:$0x3] %v479_v47 }
 0x125 PF: > { %s15_s17 = sadd.s32 1, %s754_s17   ;;  %s887_s15 = smov %s750_s16 }
 0x126   : > { %p12_p6 = scmp.ge.s32.totalorder %s15_s17, 4   ;;  %s888_s16 = smov %s890_s18 }
 0x128   :  { %14 = sbr.rel (!%p12_p6) target bundleno = 2 (0x2), region = 84 }

// kernel: vgg_forward.21
= control target key start
LH: loop header
LB: loop body
LE: loop exit
PB: predicated region body
PF: predicated region fallthrough
CT: control target
= control target key end

     0   :  { %s370_s15 = smov 0   ;;  %s399_s0 = inlined_call_operand.vmem [shape: bf16[32,128], index: 0, kind: input, shape index: {}]   ;;  %s400_s1 = inlined_call_operand.vmem [shape: f32[2,128], index: 1, kind: input, shape index: {}]   ;;  %s401_s2 = inlined_call_operand.vmem [shape: f32[1,128], index: 2, kind: input, shape index: {}]   ;;  %s402_s3 = inlined_call_operand.vmem [shape: f32[1,128], index: 3, kind: input, shape index: {}]   ;;  %s403_s4 = inlined_call_operand.vmem [shape: bf16[32,128], index: 4, kind: output, shape index: {}]  }
   0x1 LB: > { %s303_s16 = sadd.s32 4294967295, %s343_s15   ;;  %p307_p0 = scmp.ge.s32.totalorder %s343_s15, 1  ;;  %s343_s15 = sphi %s370_s15, %s14_s15  }
   0x2   : > { %p163_p1 = scmp.lt.s32.totalorder %s343_s15, 3 }
   0x4   : > { %p164_p2 = pnand %p307_p0, %p163_p1 }
   0x5   : > { %v201_v0 = vld [vmem:[%s400_s1] sm:$0x1] (!%p164_p2)  ;;  %v203_v1 = vld [vmem:[%s400_s1 + $0x1] sm:$0x1] (!%p164_p2)  ;;  %s308_s21 = sshll.u32 (!%p164_p2), %s303_s16, 1  ;;  %v220_v8 = vlaneseq (!%p164_p2) }
   0x6   : > { %167 = sbr.rel (%p164_p2) target bundleno = 42 (0x2a), region = 36  ;;  %v202_v2 = vmul.f32 (!%p164_p2), 0.03125, %v201_v0  ;;  %v204_v3 = vmul.f32 (!%p164_p2), 0.03125, %v203_v1  ;;  %p190_p3 = scmp.lt.s32.totalorder (!%p164_p2), %s308_s21, 3  ;;  %v208_v10 = vld [vmem:[%s401_s2] sm:$0x1] (!%p164_p2) }
   0x7   : > { %v221_v9 = vshrl.u32 (!%p164_p2), %v220_v8, 7  ;;  %v212_v17 = vld [vmem:[%s402_s3] sm:$0x1] (!%p164_p2) }
   0x8   : > { %v205_v4 = vmul.f32 (!%p164_p2), %v202_v2, %v202_v2 }
   0x9   : > { %v222_v12 = vsub.s32 (!%p164_p2), 0, %v221_v9 }
   0xa   : > { %v206_v5 = vsub.f32 (!%p164_p2), %v204_v3, %v205_v4 }
   0xc   : > { %v207_v6 = vmax.f32 (!%p164_p2), %v206_v5, 0.0 }
   0xd   : > { %s405_s21 = smov (!%p190_p3, %s308_s21), 3 }
   0xe   : > { %v209_v7 = vadd.f32 1e-05, %v207_v6  ;;  %s309_s22 = sshll.u32 %s405_s21, 2 }
   0xf   : > { %s193_s25 = scalar_lea.vmem %s399_s0, %s309_s22  ;;  %s199_s6 = scalar_lea.vmem %s403_s4, %s309_s22 }
  0x10   : > { %335 = vrsqrt.f32 %v209_v7  ;;  %v319_v11 = vld [vmem:[%s193_s25] sm:$0xff]  }
  0x11   : > { %v320_v15 = vunpack.c.l.bf16 %v319_v11  ;;  %v321_v16 = vunpack.c.h.bf16 %v319_v11 }
  0x1a   : > { %v336_v13 = vpop.eup %335 }
  0x1b   : > { %v211_v14 = vmul.f32 %v336_v13, %v208_v10 }
  0x1d   : > { %v213_v18 = vmul.f32 %v211_v14, %v202_v2  ;;  %v223_v19 = vrot.slane %v211_v14, %v222_v12 }
  0x1f   : > { %v214_v20 = vsub.f32 %v212_v17, %v213_v18  ;;  %v225_v21 = vmul.f32 %v320_v15, %v223_v19  ;;  %v226_v22 = vmul.f32 %v321_v16, %v223_v19 }
  0x21   : > { %v231_v23 = vrot.slane %v214_v20, %v222_v12 }
  0x23   : > { %v233_v24 = vadd.f32 %v231_v23, %v225_v21  ;;  %v234_v25 = vadd.f32 %v231_v23, %v226_v22 }
  0x25   : > { %v235_v26 = vmax.f32 %v233_v24, 0.0  ;;  %v236_v27 = vmax.f32 %v234_v25, 0.0 }
  0x27   : > { %v325_v28 = vpack.c.bf16 %v236_v27, %v235_v26 }
  0x29   : > { %326 = vst [vmem:[%s199_s6] sm:$0xff] %v325_v28  }
  0x2a PF: > { %s14_s15 = sadd.s32 1, %s343_s15  }
  0x2b   : > { %p11_p4 = scmp.ge.s32.totalorder %s14_s15, 4  }
  0x2d   :  { %13 = sbr.rel (!%p11_p4) target bundleno = 1 (0x1), region = 66 }

// kernel: vgg_forward.24
= control target key start
LH: loop header
LB: loop body
LE: loop exit
PB: predicated region body
PF: predicated region fallthrough
CT: control target
= control target key end

     0   :  { %s241_s6 = smov 0   ;;  %s258_s0 = inlined_call_operand.vmem [shape: bf16[4,2,4,32], index: 0, kind: input, shape index: {}]   ;;  %s259_s1 = inlined_call_operand.vmem [shape: bf16[4,4,32], index: 1, kind: output, shape index: {}]  }
   0x1 LB: > { %s202_s7 = sadd.s32 4294967295, %s229_s6   ;;  %p206_p0 = scmp.ge.s32.totalorder %s229_s6, 1  ;;  %s229_s6 = sphi %s241_s6, %s11_s6  }
   0x2   : > { %p89_p1 = scmp.lt.s32.totalorder %s229_s6, 3 }
   0x4   : > { %p90_p2 = pnand %p206_p0, %p89_p1 }
   0x5   : > { %s207_s8 = sshll.u32 (!%p90_p2), %s202_s7, 1  ;;  %vm128_vm0 = vcmask (!%p90_p2), 254976  }
   0x6   : > { %93 = sbr.rel (%p90_p2) target bundleno = 22 (0x16), region = 24  ;;  %p111_p3 = scmp.lt.s32.totalorder (!%p90_p2), %s207_s8, 3 }
   0xd   : > { %s261_s8 = smov (!%p111_p3, %s207_s8), 3 }
   0xe   : > { %s214_s9 = sshll.u32 %s261_s8, 2  ;;  %s211_s10 = sshll.u32 %s261_s8, 1 }
   0xf   : > { %s115_s13 = scalar_lea.vmem %s258_s0, %s214_s9  ;;  %s121_s16 = scalar_lea.vmem %s259_s1, %s211_s10 }
  0x10   : > { %v124_v0 = vld [vmem:[%s115_s13] sm:$0x3]  ;;  %v125_v1 = vld [vmem:[%s115_s13 + $0x2] sm:$0x3]  ;;  %v126_v2 = vld [vmem:[%s115_s13 + $0x4] sm:$0x3] }
  0x11   : > { %v131_v3 = vsel %vm128_vm0, %v124_v0, 4286644096  ;;  %v134_v4 = vsel %vm128_vm0, %v125_v1, 4286644096  ;;  %v127_v5 = vld [vmem:[%s115_s13 + $0x6] sm:$0x3] }
  0x12   : > { %v136_v6 = vmax.bf16 %v134_v4, %v131_v3  ;;  %v138_v7 = vsel %vm128_vm0, %v126_v2, 4286644096  ;;  %v141_v8 = vsel %vm128_vm0, %v127_v5, 4286644096 }
  0x13   : > { %v143_v9 = vmax.bf16 %v141_v8, %v138_v7 }
  0x14   : > { %144 = vst.msk [vmem:[%s121_s16] sm:$0x3] %vm128_vm0, %v136_v6 }
  0x15   : > { %145 = vst.msk [vmem:[%s121_s16 + $0x2] sm:$0x3] %vm128_vm0, %v143_v9 }
  0x16 PF: > { %s11_s6 = sadd.s32 1, %s229_s6  }
  0x17   : > { %p8_p4 = scmp.ge.s32.totalorder %s11_s6, 4  }
  0x19   :  { %10 = sbr.rel (!%p8_p4) target bundleno = 1 (0x1), region = 54 }

// kernel: vgg_forward.22
= control target key start
LH: loop header
LB: loop body
LE: loop exit
PB: predicated region body
PF: predicated region fallthrough
CT: control target
= control target key end

     0   :  { %s945_s15 = smov 0   ;;  %s947_s16 = smov 0   ;;  %s1070_s0 = inlined_call_operand.vmem [shape: bf16[32,384], index: 0, kind: input, shape index: {}]   ;;  %s1071_s1 = inlined_call_operand.vmem [shape: bf16[384,128], index: 1, kind: input, shape index: {}]   ;;  %s1072_s2 = inlined_call_operand.vmem [shape: f32[1,128], index: 2, kind: input, shape index: {}]   ;;  %s1073_s3 = inlined_call_operand.vmem [shape: bf16[32,128], index: 3, kind: output, shape index: {0}]   ;;  %s1074_s4 = inlined_call_operand.vmem [shape: f32[2,128], index: 4, kind: output, shape index: {1}]  }
   0x1   :  { %s949_s17 = smov 0  }
   0x2 LB: > { %s24_s18 = sadd.s32 1, %s911_s16  ;;  %p740_p0 = scmp.ge.s32.totalorder %s915_s17, 1  ;;  %s915_s17 = sphi %s949_s17, %s15_s17   ;;  %s911_s16 = sphi %s947_s16, %s1076_s16   ;;  %s907_s15 = sphi %s945_s15, %s1075_s15  }
   0x3   : > { %p25_p1 = scmp.ge.s32.totalorder %s24_s18, 2  ;;  %p198_p2 = scmp.lt.s32.totalorder %s915_s17, 3 }
   0x5   : > { %s1078_s18 = smov (%p25_p1, %s24_s18), 0  ;;  %p199_p3 = pnand %p740_p0, %p198_p2 }
   0x6   : > { %s741_s19 = sshll.u32 (!%p199_p3), %s907_s15, 1  ;;  %p745_p5 = scmp.ne.s32.totalorder (!%p199_p3), %s907_s15, 0 }
   0x7   : > { %202 = sbr.rel (%p199_p3) target bundleno = 295 (0x127), region = 32  ;;  %p240_p4 = scmp.lt.s32.totalorder (!%p199_p3), %s741_s19, 3 }
   0xe   : > { %s1080_s19 = smov (!%p240_p4, %s741_s19), 3  ;;  %270 = sbr.rel (%p745_p5) target bundleno = 21 (0x15), region = 36 }
   0xf   : > { %s837_s20 = smul.u32 12, %s1080_s19  ;;  %s744_s21 = sshll.u32 %s1080_s19, 2  ;;  %v917_v0 = vmov (!%p745_p5), 0.0  }
  0x10   : > { %s966_s24 = scalar_lea.vmem %s1073_s3, %s744_s21  ;;  %271 = vst [vmem:[%s1074_s4] sm:$0x3] (!%p745_p5), %v917_v0 }
  0x11   : > { %s971_s27 = scalar_lea.vmem %s1070_s0, %s837_s20 }
  0x15 PF: > { %v865_v1 = vld [vmem:[%s1071_s1 + $0x40] sm:$0xff]   ;;  %v918_v3 = vmov 0.0   ;;  %vm919_vm0 = vmmov 0   ;;  %v868_v5 = vld [vmem:[%s1071_s1 + $0x48] sm:$0xff]   ;;  %v871_v8 = vld [vmem:[%s1071_s1 + $0x50] sm:$0xff]   ;;  %vm590_vm1 = vcmask 1040384  }
  0x16   : > { %v866_v2 = vld [vmem:[%s1071_s1] sm:$0xff]   ;;  %817 = vmatprep.subr.bf16.mxu1 %v918_v3  ;;  %786 = vmatprep.subr.bf16.mxu0 %v865_v1  ;;  %v869_v6 = vld [vmem:[%s1071_s1 + $0x8] sm:$0xff]   ;;  %v872_v9 = vld [vmem:[%s1071_s1 + $0x10] sm:$0xff]  }
  0x17   : > { %v867_v4 = vld [vmem:[%s1071_s1 + $0x80] sm:$0xff]   ;;  %833 = vmatprep.mubr.msk.bf16.mxu1 %vm919_vm0, %v918_v3  ;;  %787 = vmatpush3.bf16.msra.mxu0 %v866_v2  ;;  %v870_v7 = vld [vmem:[%s1071_s1 + $0x88] sm:$0xff]   ;;  %v873_v10 = vld [vmem:[%s1071_s1 + $0x90] sm:$0xff]  }
  0x18   : > { %818 = vmatpush3.bf16.msra.mxu1 %v867_v4  ;;  %788 = vmatprep.subr.bf16.mxu0 %v868_v5  ;;  %v874_v11 = vld [vmem:[%s1071_s1 + $0x58] sm:$0xff]   ;;  %v877_v14 = vld [vmem:[%s1071_s1 + $0x60] sm:$0xff]   ;;  %v880_v17 = vld [vmem:[%s1071_s1 + $0x68] sm:$0xff]  }
  0x19   : > { %819 = vmatprep.subr.bf16.mxu1 %v918_v3  ;;  %v875_v12 = vld [vmem:[%s1071_s1 + $0x18] sm:$0xff]   ;;  %v878_v15 = vld [vmem:[%s1071_s1 + $0x20] sm:$0xff]   ;;  %v881_v18 = vld [vmem:[%s1071_s1 + $0x28] sm:$0xff]  }
  0x1a   : > { %v876_v13 = vld [vmem:[%s1071_s1 + $0x98] sm:$0xff]   ;;  %v879_v16 = vld [vmem:[%s1071_s1 + $0xa0] sm:$0xff]   ;;  %v882_v19 = vld [vmem:[%s1071_s1 + $0xa8] sm:$0xff]  }
  0x1b   : > { %789 = vmatpush3.bf16.msra.mxu0 %v869_v6  ;;  %v883_v20 = vld [vmem:[%s1071_s1 + $0x70] sm:$0xff]   ;;  %v886_v23 = vld [vmem:[%s1071_s1 + $0x78] sm:$0xff]   ;;  %v888_v27 = vld [vmem:[%s971_s27] ss:$12 sps:$4 sm:$0xff]  }
  0x1c   : > { %820 = vmatpush3.bf16.msra.mxu1 %v870_v7  ;;  %790 = vmatprep.subr.bf16.mxu0 %v871_v8  ;;  %v884_v21 = vld [vmem:[%s1071_s1 + $0x30] sm:$0xff]   ;;  %v887_v25 = vld [vmem:[%s1071_s1 + $0x38] sm:$0xff]   ;;  %v746_v31 = vld [vmem:[%s1072_s2] ss:$0 sm:$0xff] }
  0x1d   : > { %821 = vmatprep.subr.bf16.mxu1 %v918_v3  ;;  %v885_v22 = vld [vmem:[%s1071_s1 + $0xb0] sm:$0xff]   ;;  %v891_v26 = vld [vmem:[%s1071_s1 + $0xb8] sm:$0xff]   ;;  %v589_v61 = vld [vmem:[%s1074_s4] sm:$0x3] }
  0x1e   : > { %v890_v24 = vld [vmem:[%s971_s27 + $0x4] ss:$12 sps:$4 sm:$0xff]   ;;  %v892_v28 = vld [vmem:[%s971_s27 + $0x8] ss:$12 sps:$4 sm:$0xff]  }
  0x1f   : > { %791 = vmatpush3.bf16.msra.mxu0 %v872_v9  ;;  %523 = vmatprep.mubr.bf16.mxu0 %v890_v24 }
  0x20   : > { %822 = vmatpush3.bf16.msra.mxu1 %v873_v10  ;;  %792 = vmatprep.subr.bf16.mxu0 %v874_v11 }
  0x21   : > { %823 = vmatprep.subr.bf16.mxu1 %v918_v3 }
  0x23   : > { %793 = vmatpush3.bf16.msra.mxu0 %v875_v12 }
  0x24   : > { %824 = vmatpush3.bf16.msra.mxu1 %v876_v13  ;;  %794 = vmatprep.subr.bf16.mxu0 %v877_v14 }
  0x25   : > { %825 = vmatprep.subr.bf16.mxu1 %v918_v3 }
  0x27   : > { %795 = vmatpush3.bf16.msra.mxu0 %v878_v15 }
  0x28   : > { %826 = vmatpush3.bf16.msra.mxu1 %v879_v16  ;;  %796 = vmatprep.subr.bf16.mxu0 %v880_v17 }
  0x29   : > { %827 = vmatprep.subr.bf16.mxu1 %v918_v3 }
  0x2b   : > { %797 = vmatpush3.bf16.msra.mxu0 %v881_v18 }
  0x2c   : > { %828 = vmatpush3.bf16.msra.mxu1 %v882_v19  ;;  %798 = vmatprep.subr.bf16.mxu0 %v883_v20 }
  0x2d   : > { %829 = vmatprep.subr.bf16.mxu1 %v918_v3 }
  0x2f   : > { %799 = vmatpush3.bf16.msra.mxu0 %v884_v21 }
  0x30   : > { %830 = vmatpush3.bf16.msra.mxu1 %v885_v22  ;;  %800 = vmatprep.subr.bf16.mxu0 %v886_v23 }
  0x31   : > { %831 = vmatprep.subr.bf16.mxu1 %v918_v3 }
  0x33   : > { %801 = vmatpush3.bf16.msra.mxu0 %v887_v25 }
  0x34   : > { %832 = vmatpush3.bf16.msra.mxu1 %v891_v26 }
  0x36   : > { %524 = vmatmul.mubr.bf16.vlgmr.msra.gmra.mrb[0].mxu0 %v888_v27 }
  0x37   : > { %834 = vmatmul.mubr.bf16.vlgmr.msra.gmra.mrb[0].mxu1 %v892_v28 }
 0x109   : > { %v802_v29 = vpop.f32.mrb[0].mxu0 }
 0x10a   : > { %v803_v30 = vpop.f32.mrb[1].mxu0  ;;  %v566_v32 = vpop.f32.mrb[0].mxu1 }
 0x10b   : > { %v804_v33 = vadd.f32 %v803_v30, %v802_v29  ;;  %v805_v34 = vpop.f32.mrb[2].mxu0  ;;  %v835_v35 = vpop.f32.mrb[1].mxu1 }
 0x10c   : > { %v806_v36 = vpop.f32.mrb[3].mxu0  ;;  %v569_v37 = vpop.f32.mrb[2].mxu1 }
 0x10d   : > { %v526_v38 = vadd.f32 %v804_v33, %v746_v31  ;;  %v807_v39 = vadd.f32 %v806_v36, %v805_v34  ;;  %v836_v40 = vpop.f32.mrb[3].mxu1 }
 0x10f   : > { %v567_v41 = vadd.f32 %v566_v32, %v526_v38  ;;  %v529_v42 = vadd.f32 %v807_v39, %v746_v31 }
 0x111   : > { %v570_v43 = vadd.f32 %v569_v37, %v529_v42  ;;  %v580_v44 = vmul.f32 %v567_v41, %v567_v41 }
 0x113   : > { %v573_v45 = vadd.f32 %v570_v43, %v567_v41  ;;  %v581_v46 = vmul.f32 %v570_v43, %v570_v43  ;;  %v784_v47 = vpack.c.bf16 %v570_v43, %v567_v41 }
 0x115   : > { %v574_v48 = vrot.slane %v573_v45, 4  ;;  %v582_v49 = vadd.f32 %v581_v46, %v580_v44  ;;  %785 = vst [vmem:[%s966_s24] sm:$0xff] %v784_v47  }
 0x117   : > { %v575_v50 = vadd.f32 %v574_v48, %v573_v45  ;;  %v583_v51 = vrot.slane %v582_v49, 4 }
 0x119   : > { %v576_v52 = vrot.slane %v575_v50, 2  ;;  %v584_v53 = vadd.f32 %v583_v51, %v582_v49 }
 0x11b   : > { %v577_v54 = vadd.f32 %v576_v52, %v575_v50  ;;  %v585_v55 = vrot.slane %v584_v53, 2 }
 0x11d   : > { %v578_v56 = vrot.slane %v577_v54, 1  ;;  %v586_v57 = vadd.f32 %v585_v55, %v584_v53 }
 0x11f   : > { %v587_v58 = vrot.slane %v586_v57, 1  ;;  %v579_v59 = vadd.f32 %v578_v56, %v577_v54 }
 0x121   : > { %v588_v60 = vadd.f32 %v587_v58, %v586_v57 }
 0x123   : > { %v591_v62 = vsel %vm590_vm1, %v579_v59, %v588_v60 }
 0x124   : > { %v592_v63 = vadd.f32 %v591_v62, %v589_v61 }
 0x126   : > { %593 = vst [vmem:[%s1074_s4] sm:$0x3] %v592_v63 }
 0x127 PF: > { %s15_s17 = sadd.s32 1, %s915_s17   ;;  %s1075_s15 = smov %s911_s16 }
 0x128   : > { %p12_p6 = scmp.ge.s32.totalorder %s15_s17, 4   ;;  %s1076_s16 = smov %s1078_s18 }
 0x12a   :  { %14 = sbr.rel (!%p12_p6) target bundleno = 2 (0x2), region = 84 }

// kernel: vgg_forward.25
= control target key start
LH: loop header
LB: loop body
LE: loop exit
PB: predicated region body
PF: predicated region fallthrough
CT: control target
= control target key end

     0   :  { %v181_v0 = vmov 0.0   ;;  %vm182_vm0 = vmmov 0   ;;  %s236_s1 = inlined_call_operand.vmem [shape: bf16[128,128], index: 1, kind: input, shape index: {}]   ;;  %s237_s0 = inlined_call_operand.vmem [shape: bf16[8,128], index: 0, kind: input, shape index: {}]   ;;  %s238_s2 = inlined_call_operand.vmem [shape: f32[1,128], index: 2, kind: input, shape index: {}]   ;;  %s239_s3 = inlined_call_operand.vmem [shape: f32[8,128], index: 3, kind: output, shape index: {}]  }
   0x1   :  { %151 = vmatprep.subr.bf16.mxu0 %v181_v0  ;;  %v173_v1 = vld [vmem:[%s236_s1] sm:$0xff]   ;;  %167 = vmatprep.mubr.msk.bf16.mxu0 %vm182_vm0, %v181_v0  ;;  %v174_v2 = vld [vmem:[%s236_s1 + $0x8] sm:$0xff]   ;;  %v175_v3 = vld [vmem:[%s236_s1 + $0x10] sm:$0xff]  }
   0x2   :  { %152 = vmatpush3.bf16.msra.mxu0 %v173_v1  ;;  %v176_v4 = vld [vmem:[%s236_s1 + $0x18] sm:$0xff]   ;;  %v177_v5 = vld [vmem:[%s236_s1 + $0x20] sm:$0xff]   ;;  %v178_v6 = vld [vmem:[%s236_s1 + $0x28] sm:$0xff]  }
   0x3   :  { %153 = vmatprep.subr.bf16.mxu0 %v181_v0  ;;  %v179_v7 = vld [vmem:[%s236_s1 + $0x30] sm:$0xff]   ;;  %v180_v8 = vld [vmem:[%s236_s1 + $0x38] sm:$0xff]   ;;  %v15_v9 = vld [vmem:[%s237_s0] sm:$0xf] }
   0x4   :  { %v133_v10 = vld [vmem:[%s238_s2] ss:$0 sm:$0xff] }
   0x6   :  { %154 = vmatpush3.bf16.msra.mxu0 %v174_v2 }
   0x7   :  { %155 = vmatprep.subr.bf16.mxu0 %v181_v0 }
   0xa   :  { %156 = vmatpush3.bf16.msra.mxu0 %v175_v3 }
   0xb   :  { %157 = vmatprep.subr.bf16.mxu0 %v181_v0 }
   0xe   :  { %158 = vmatpush3.bf16.msra.mxu0 %v176_v4 }
   0xf   :  { %159 = vmatprep.subr.bf16.mxu0 %v181_v0 }
  0x12   :  { %160 = vmatpush3.bf16.msra.mxu0 %v177_v5 }
  0x13   :  { %161 = vmatprep.subr.bf16.mxu0 %v181_v0 }
  0x16   :  { %162 = vmatpush3.bf16.msra.mxu0 %v178_v6 }
  0x17   :  { %163 = vmatprep.subr.bf16.mxu0 %v181_v0 }
  0x1a   :  { %164 = vmatpush3.bf16.msra.mxu0 %v179_v7 }
  0x1b   :  { %165 = vmatprep.subr.bf16.mxu0 %v181_v0 }
  0x1e   :  { %166 = vmatpush3.bf16.msra.mxu0 %v180_v8 }
  0x21   :  { %168 = vmatmul.mubr.bf16.vlgmr.msra.gmra.mrb[0].mxu0 %v15_v9 }
  0xf4   :  { %v121_v11 = vpop.f32.mrb[0].mxu0 }
  0xf5   :  { %v122_v12 = vadd.f32 %v133_v10, %v121_v11  ;;  %v169_v13 = vpop.f32.mrb[1].mxu0 }
  0xf6   :  { %v124_v14 = vpop.f32.mrb[2].mxu0 }
  0xf7   :  { %v127_v15 = vmax.f32 %v122_v12, 0.0  ;;  %v170_v16 = vpop.f32.mrb[3].mxu0 }
  0xf9   :  { %128 = vst [vmem:[%s239_s3] sm:$0xff] %v127_v15 }

</bundles_post_ra>
